<compile_context>
chip_gen: v5e
topology: v5e:2x2
jax: 0.10.0
libtpu: 0.0.40
codegen_flags: <defaults>
</compile_context>

<pallas_src>
import functools

import jax
import jax.numpy as jnp
from jax import lax
from jax.experimental import pallas as pl
from jax.experimental.pallas import tpu as pltpu


# ----------------------------- helpers ---------------------------------------

def _pick_tile(dim, target, quantum):
    """Largest legal tile <= target: either the full dim (always legal) or a
    multiple of `quantum` (8 for sublane dims, 128 for lane dims) dividing dim."""
    if dim <= target:
        return dim
    t = (target // quantum) * quantum
    while t >= quantum:
        if dim % t == 0:
            return t
        t -= quantum
    return dim  # fall back to the untiled (full) dimension


def _vmem_limit_bytes(frac=0.66):
    """Generation-aware scoped-VMEM budget (v5e/v6e: 128 MiB, v7x: 64 MiB)."""
    try:
        cap = int(pltpu.get_tpu_info().vmem_capacity_bytes)
    except Exception:
        cap = 64 * 1024 * 1024
    return max(32 * 1024 * 1024, int(cap * frac))


def _compiler_params(semantics):
    return pltpu.CompilerParams(
        dimension_semantics=semantics,
        vmem_limit_bytes=_vmem_limit_bytes(),
    )


# ----------------------------- Tiled Linear (matmul + bias) ------------------

def _linear_kernel(x_ref, w_ref, b_ref, o_ref, acc_ref):
    # x: (TM, TK), w: (TK, TN) bf16, b: (1, TN) f32, o: (TM, TN); acc f32.
    k = pl.program_id(2)

    @pl.when(k == 0)
    def _():
        acc_ref[...] = jnp.zeros_like(acc_ref)

    # bf16 MXU operands (weights stored bf16), f32 accumulation.
    acc_ref[...] += jnp.dot(
        x_ref[...].astype(w_ref.dtype), w_ref[...],
        preferred_element_type=jnp.float32,
    )

    @pl.when(k == pl.num_programs(2) - 1)
    def _():
        o_ref[...] = (acc_ref[...] + b_ref[...].astype(jnp.float32)).astype(o_ref.dtype)


def linear(x, w_t, b, *, out_dtype=None, tm=512, tn=512, tk=512):
    """x: (M, K); w_t: (K, N) pre-transposed (bf16); b: (N,) f32."""
    M, K = x.shape
    Kw, N = w_t.shape
    assert K == Kw
    out_dtype = out_dtype or x.dtype
    tm = _pick_tile(M, tm, 8)
    tn = _pick_tile(N, tn, 128)
    tk = _pick_tile(K, tk, 128)
    grid = (M // tm, N // tn, K // tk)
    return pl.pallas_call(
        _linear_kernel,
        out_shape=jax.ShapeDtypeStruct((M, N), out_dtype),
        grid_spec=pltpu.PrefetchScalarGridSpec(
            num_scalar_prefetch=0,
            grid=grid,
            in_specs=[
                pl.BlockSpec((tm, tk), lambda i, j, k: (i, k)),
                pl.BlockSpec((tk, tn), lambda i, j, k: (k, j)),
                pl.BlockSpec((1, tn), lambda i, j, k: (0, j)),
            ],
            out_specs=pl.BlockSpec((tm, tn), lambda i, j, k: (i, j)),
            scratch_shapes=[pltpu.VMEM((tm, tn), jnp.float32)],
        ),
        compiler_params=_compiler_params(("parallel", "parallel", "arbitrary")),
    )(x, w_t, b.reshape(1, N))


# ----------------------------- Attention pass 1: row log-sum-exp -------------

def _mha_lse_kernel(q_ref, k_ref, lse_ref, m_sc, l_sc, *, n_heads, d_query):
    # q: (1, TQ, H*dq) bf16 (already scaled by 1/sqrt(dq) via folded weights)
    # k: (1, TK, H*dq) bf16 ; lse out: (1, TQ, H) f32 ; m/l scratch: (TQ, H) f32
    ki = pl.program_id(2)

    @pl.when(ki == 0)
    def _():
        m_sc[...] = jnp.full_like(m_sc, -jnp.inf)
        l_sc[...] = jnp.zeros_like(l_sc)

    q = q_ref[0]
    k = k_ref[0]

    for h in range(n_heads):                           # static unroll over heads
        qh = q[:, h * d_query:(h + 1) * d_query]       # (TQ, dq)
        kh = k[:, h * d_query:(h + 1) * d_query]       # (TK, dq)
        s = lax.dot_general(qh, kh, (((1,), (1,)), ((), ())),
                            preferred_element_type=jnp.float32)   # (TQ, TK)
        m_prev = m_sc[:, h:h + 1]                                  # (TQ, 1)
        m_new = jnp.maximum(m_prev, jnp.max(s, axis=-1, keepdims=True))
        l_new = (l_sc[:, h:h + 1] * jnp.exp(m_prev - m_new)
                 + jnp.sum(jnp.exp(s - m_new), axis=-1, keepdims=True))
        m_sc[:, h:h + 1] = m_new
        l_sc[:, h:h + 1] = l_new

    @pl.when(ki == pl.num_programs(2) - 1)
    def _():
        lse_ref[0] = m_sc[...] + jnp.log(l_sc[...])    # (TQ, H)


def mha_lse(q_c, k_c, *, n_heads, d_query, tq=128, tk=256):
    B, S, hdq = q_c.shape
    tq = _pick_tile(S, tq, 8)
    tk = _pick_tile(S, tk, 128)
    grid = (B, S // tq, S // tk)
    kernel = functools.partial(_mha_lse_kernel, n_heads=n_heads, d_query=d_query)
    return pl.pallas_call(
        kernel,
        out_shape=jax.ShapeDtypeStruct((B, S, n_heads), jnp.float32),
        grid_spec=pltpu.PrefetchScalarGridSpec(
            num_scalar_prefetch=0,
            grid=grid,
            in_specs=[
                pl.BlockSpec((1, tq, hdq), lambda b, qi, ki: (b, qi, 0)),
                pl.BlockSpec((1, tk, hdq), lambda b, qi, ki: (b, ki, 0)),
            ],
            out_specs=pl.BlockSpec((1, tq, n_heads), lambda b, qi, ki: (b, qi, 0)),
            scratch_shapes=[
                pltpu.VMEM((tq, n_heads), jnp.float32),
                pltpu.VMEM((tq, n_heads), jnp.float32),
            ],
        ),
        compiler_params=_compiler_params(("parallel", "parallel", "arbitrary")),
    )(q_c, k_c)


# ---------------- Attention pass 2: probs + p@V + fused output projection ----

def _mha_out_kernel(q_ref, k_ref, v_ref, lse_ref, w_out_ref, b_out_ref,
                    o_ref, attn_ref, acc_sc, *, n_heads, d_query, d_value):
    # q: (1,TQ,H*dq) bf16, k: (1,TK,H*dq) bf16, v: (1,TK,H*dv) bf16,
    # lse: (1,TQ,H) f32, w_out: (H*dv, d_model) bf16, b_out: (1, d_model) f32,
    # o: (1,TQ,d_model), attn: (1,H,TQ,TK), acc scratch: (TQ, H*dv) f32.
    ki = pl.program_id(2)

    @pl.when(ki == 0)
    def _():
        acc_sc[...] = jnp.zeros_like(acc_sc)

    q = q_ref[0]
    k = k_ref[0]
    v = v_ref[0]
    lse = lse_ref[0]                                   # (TQ, H) f32

    for h in range(n_heads):                           # static unroll over heads
        qh = q[:, h * d_query:(h + 1) * d_query]
        kh = k[:, h * d_query:(h + 1) * d_query]
        vh = v[:, h * d_value:(h + 1) * d_value]
        s = lax.dot_general(qh, kh, (((1,), (1,)), ((), ())),
                            preferred_element_type=jnp.float32)   # (TQ, TK)
        # Normalized probabilities without a divide: p = exp(s - (m + log l)).
        p = jnp.exp(s - lse[:, h:h + 1])
        attn_ref[0, h] = p.astype(attn_ref.dtype)      # per-head store, no concat
        acc_sc[:, h * d_value:(h + 1) * d_value] += jnp.dot(
            p.astype(v.dtype), vh, preferred_element_type=jnp.float32)

    @pl.when(ki == pl.num_programs(2) - 1)
    def _():
        # Fused output projection: (TQ, H*dv) @ (H*dv, d_model) + bias.
        out = jnp.dot(acc_sc[...].astype(w_out_ref.dtype), w_out_ref[...],
                      preferred_element_type=jnp.float32)
        out = out + b_out_ref[...].astype(jnp.float32)
        o_ref[0] = out.astype(o_ref.dtype)


def mha_out(q_c, k_c, v_c, lse, w_out_t, b_out, *, n_heads, d_query, d_value,
            out_dtype, attn_dtype=jnp.float32, tq=128, tk=256):
    B, S, hdq = q_c.shape
    hdv = n_heads * d_value
    d_model = w_out_t.shape[1]
    tq = _pick_tile(S, tq, 8)
    tk = _pick_tile(S, tk, 128)
    grid = (B, S // tq, S // tk)
    kernel = functools.partial(_mha_out_kernel, n_heads=n_heads,
                               d_query=d_query, d_value=d_value)
    return pl.pallas_call(
        kernel,
        out_shape=(
            jax.ShapeDtypeStruct((B, S, d_model), out_dtype),
            jax.ShapeDtypeStruct((B, n_heads, S, S), attn_dtype),
        ),
        grid_spec=pltpu.PrefetchScalarGridSpec(
            num_scalar_prefetch=0,
            grid=grid,
            in_specs=[
                pl.BlockSpec((1, tq, hdq), lambda b, qi, ki: (b, qi, 0)),
                pl.BlockSpec((1, tk, hdq), lambda b, qi, ki: (b, ki, 0)),
                pl.BlockSpec((1, tk, hdv), lambda b, qi, ki: (b, ki, 0)),
                pl.BlockSpec((1, tq, n_heads), lambda b, qi, ki: (b, qi, 0)),
                pl.BlockSpec((hdv, d_model), lambda b, qi, ki: (0, 0)),
                pl.BlockSpec((1, d_model), lambda b, qi, ki: (0, 0)),
            ],
            out_specs=(
                pl.BlockSpec((1, tq, d_model), lambda b, qi, ki: (b, qi, 0)),
                pl.BlockSpec((1, n_heads, tq, tk), lambda b, qi, ki: (b, 0, qi, ki)),
            ),
            scratch_shapes=[pltpu.VMEM((tq, hdv), jnp.float32)],
        ),
        compiler_params=_compiler_params(("parallel", "parallel", "arbitrary")),
    )(q_c, k_c, v_c, lse, w_out_t, b_out.reshape(1, d_model))


# ----------------------------- MultiHeadAttention forward --------------------

@functools.partial(jax.jit,
                   static_argnames=("n_heads", "d_query", "d_value", "self_attention"))
def multi_head_attention(Q, K, V, params, *, n_heads, d_query, d_value,
                         self_attention=False):
    """Q, K, V: (B, S, d_model). Returns (aggregated (B,S,d_model), attn (B,H,S,S))."""
    B, S, d_model = Q.shape
    hq = n_heads * d_query
    hv = n_heads * d_value

    if self_attention:
        # Fused QKV projection: single pass over the activations (Q is K is V).
        w_qkv_t = jnp.concatenate(
            [params["w_q_t"], params["w_k_t"], params["w_v_t"]], axis=1)
        b_qkv = jnp.concatenate([params["b_q"], params["b_k"], params["b_v"]])
        qkv = linear(Q.reshape(B * S, d_model), w_qkv_t, b_qkv,
                     out_dtype=jnp.bfloat16)
        q_c, k_c, v_c = qkv[:, :hq], qkv[:, hq:2 * hq], qkv[:, 2 * hq:]
    else:
        q_c = linear(Q.reshape(B * S, d_model), params["w_q_t"], params["b_q"],
                     out_dtype=jnp.bfloat16)
        k_c = linear(K.reshape(B * S, d_model), params["w_k_t"], params["b_k"],
                     out_dtype=jnp.bfloat16)
        v_c = linear(V.reshape(B * S, d_model), params["w_v_t"], params["b_v"],
                     out_dtype=jnp.bfloat16)

    q_c = q_c.reshape(B, S, hq)
    k_c = k_c.reshape(B, S, hq)
    v_c = v_c.reshape(B, S, hv)

    # Pass 1: per-row log-sum-exp statistics (online max/sum over KV tiles).
    lse = mha_lse(q_c, k_c, n_heads=n_heads, d_query=d_query)

    # Pass 2: normalized probabilities, p@V accumulation, fused W_out projection.
    aggregated, attn_score = mha_out(
        q_c, k_c, v_c, lse, params["w_out_t"], params["b_out"],
        n_heads=n_heads, d_query=d_query, d_value=d_value, out_dtype=Q.dtype)
    # TODO(synk): dropout on attn_score / aggregated omitted (eval-mode semantics).
    return aggregated, attn_score


# ----------------------------- Parameter init (xavier_uniform, zero bias) ----

def _xavier_uniform_t(key, out_features, in_features):
    # torch Linear weight is (out, in); generate it, then store transposed so
    # the hot path never does a weight .T.
    bound = (6.0 / (in_features + out_features)) ** 0.5
    w = jax.random.uniform(key, (out_features, in_features), jnp.float32, -bound, bound)
    return w.T  # (in_features, out_features)


def init_params(key, n_heads, d_model, d_query, d_value):
    k1, k2, k3, k4 = jax.random.split(key, 4)
    scale = 1.0 / (float(d_query) ** 0.5)
    # Fold 1/sqrt(d_query) into the query projection (bias is zero, so the
    # fold on b_q is a no-op; a nonzero bias would be scaled the same way).
    w_q_t = _xavier_uniform_t(k1, n_heads * d_query, d_model) * scale
    return {
        "w_q_t": w_q_t.astype(jnp.bfloat16),
        "b_q": jnp.zeros((n_heads * d_query,), jnp.float32),
        "w_k_t": _xavier_uniform_t(k2, n_heads * d_query, d_model).astype(jnp.bfloat16),
        "b_k": jnp.zeros((n_heads * d_query,), jnp.float32),
        "w_v_t": _xavier_uniform_t(k3, n_heads * d_value, d_model).astype(jnp.bfloat16),
        "b_v": jnp.zeros((n_heads * d_value,), jnp.float32),
        "w_out_t": _xavier_uniform_t(k4, d_model, n_heads * d_value).astype(jnp.bfloat16),
        "b_out": jnp.zeros((d_model,), jnp.float32),
    }


# ----------------------------- Main ------------------------------------------

if __name__ == "__main__":
    B, S = 2, 8
    n_heads, d_model, d_query, d_value = 4, 32, 8, 8

    key = jax.random.PRNGKey(0)
    kp, kq, kk, kv = jax.random.split(key, 4)

    params = init_params(kp, n_heads, d_model, d_query, d_value)
    Q = jax.random.normal(kq, (B, S, d_model), jnp.float32)
    K = jax.random.normal(kk, (B, S, d_model), jnp.float32)
    V = jax.random.normal(kv, (B, S, d_model), jnp.float32)

    # General (cross-)attention path.
    aggregated, attn = multi_head_attention(
        Q, K, V, params, n_heads=n_heads, d_query=d_query, d_value=d_value)
    jax.block_until_ready((aggregated, attn))

    assert aggregated.shape == (B, S, d_model)
    assert attn.shape == (B, n_heads, S, S)
    assert bool(jnp.all(jnp.isfinite(aggregated)))
    assert bool(jnp.allclose(jnp.sum(attn, axis=-1), 1.0, atol=1e-4))

    # Self-attention path exercising the fused QKV projection.
    agg2, attn2 = multi_head_attention(
        Q, Q, Q, params, n_heads=n_heads, d_query=d_query, d_value=d_value,
        self_attention=True)
    jax.block_until_ready((agg2, attn2))
    assert agg2.shape == (B, S, d_model)
    assert attn2.shape == (B, n_heads, S, S)
    assert bool(jnp.allclose(jnp.sum(attn2, axis=-1), 1.0, atol=1e-4))

    print("KERNEL_OK")
</pallas_src>

<mosaic_0001>
module attributes {stable_mosaic.version = 11 : i64} {
  func.func @_linear_kernel(%arg0: i32, %arg1: i32, %arg2: i32, %arg3: memref<16x32xf32, #tpu.memory_space<vmem>>, %arg4: memref<32x32xbf16, #tpu.memory_space<vmem>>, %arg5: memref<1x32xf32, #tpu.memory_space<vmem>>, %arg6: memref<16x32xbf16, #tpu.memory_space<vmem>>, %arg7: memref<16x32xf32, #tpu.memory_space<vmem>>) attributes {dimension_semantics = [#tpu.dimension_semantics<parallel>, #tpu.dimension_semantics<parallel>, #tpu.dimension_semantics<arbitrary>], iteration_bounds = array<i64: 1, 1, 1>, scalar_prefetch = 0 : i64, scratch_operands = 1 : i64, tpu.core_type = #tpu.core_type<tc>, window_params = [{transform_indices = @transform_0, window_bounds = array<i64: 16, 32>}, {transform_indices = @transform_1, window_bounds = array<i64: 32, 32>}, {transform_indices = @transform_2, window_bounds = array<i64: 1, 32>}, {transform_indices = @transform_3, window_bounds = array<i64: 16, 32>}]} {
    %c0_i32 = arith.constant 0 : i32
    %0 = arith.cmpi eq, %arg2, %c0_i32 : i32
    %1 = arith.extui %0 : i1 to i32
    %c0_i32_0 = arith.constant 0 : i32
    %2 = arith.cmpi ne, %1, %c0_i32_0 : i32
    scf.if %2 {
      %cst_10 = arith.constant 0.000000e+00 : f32
      %13 = vector.broadcast %cst_10 : f32 to vector<16x32xf32>
      %c0_11 = arith.constant 0 : index
      %c0_12 = arith.constant 0 : index
      %14 = vector.load %arg7[%c0_11, %c0_12] : memref<16x32xf32, #tpu.memory_space<vmem>>, vector<16x32xf32>
      tpu.vector_store %arg7[%c0_11, %c0_12], %13 {strides = array<i32>} : memref<16x32xf32, #tpu.memory_space<vmem>>, vector<16x32xf32>,
    } else {
    }
    %c0 = arith.constant 0 : index
    %c0_1 = arith.constant 0 : index
    %3 = vector.load %arg7[%c0, %c0_1] : memref<16x32xf32, #tpu.memory_space<vmem>>, vector<16x32xf32>
    %c0_2 = arith.constant 0 : index
    %c0_3 = arith.constant 0 : index
    %4 = vector.load %arg3[%c0_2, %c0_3] : memref<16x32xf32, #tpu.memory_space<vmem>>, vector<16x32xf32>
    %5 = arith.truncf %4 : vector<16x32xf32> to vector<16x32xbf16>
    %c0_4 = arith.constant 0 : index
    %c0_5 = arith.constant 0 : index
    %6 = vector.load %arg4[%c0_4, %c0_5] : memref<32x32xbf16, #tpu.memory_space<vmem>>, vector<32x32xbf16>
    %cst = arith.constant dense<0.000000e+00> : vector<16x32xf32>
    %7 = tpu.matmul %5, %6, %cst {dimension_numbers = #tpu.dot_dimension_numbers<[1], [0], [0], [1], [0, 0, 1, 1], [], []>} : vector<16x32xbf16>, vector<32x32xbf16>, vector<16x32xf32> -> vector<16x32xf32>
    %8 = arith.addf %3, %7 : vector<16x32xf32>
    %c0_6 = arith.constant 0 : index
    %c0_7 = arith.constant 0 : index
    %9 = vector.load %arg7[%c0_6, %c0_7] : memref<16x32xf32, #tpu.memory_space<vmem>>, vector<16x32xf32>
    tpu.vector_store %arg7[%c0_6, %c0_7], %8 {strides = array<i32>} : memref<16x32xf32, #tpu.memory_space<vmem>>, vector<16x32xf32>,
    %c0_i32_8 = arith.constant 0 : i32
    %10 = arith.cmpi eq, %arg2, %c0_i32_8 : i32
    %11 = arith.extui %10 : i1 to i32
    %c0_i32_9 = arith.constant 0 : i32
    %12 = arith.cmpi ne, %11, %c0_i32_9 : i32
    scf.if %12 {
      %c0_10 = arith.constant 0 : index
      %c0_11 = arith.constant 0 : index
      %13 = vector.load %arg7[%c0_10, %c0_11] : memref<16x32xf32, #tpu.memory_space<vmem>>, vector<16x32xf32>
      %c0_12 = arith.constant 0 : index
      %c0_13 = arith.constant 0 : index
      %14 = vector.load %arg5[%c0_12, %c0_13] : memref<1x32xf32, #tpu.memory_space<vmem>>, vector<1x32xf32>
      %15 = vector.broadcast %14 : vector<1x32xf32> to vector<16x32xf32>
      %16 = arith.addf %13, %15 : vector<16x32xf32>
      %17 = arith.truncf %16 : vector<16x32xf32> to vector<16x32xbf16>
      %c0_14 = arith.constant 0 : index
      %c0_15 = arith.constant 0 : index
      %18 = vector.load %arg6[%c0_14, %c0_15] : memref<16x32xbf16, #tpu.memory_space<vmem>>, vector<16x32xbf16>
      tpu.vector_store %arg6[%c0_14, %c0_15], %17 {strides = array<i32>} : memref<16x32xbf16, #tpu.memory_space<vmem>>, vector<16x32xbf16>,
    } else {
    }
    return
  }
  func.func @transform_0(%arg0: i32, %arg1: i32, %arg2: i32) -> (i32, i32) {
    %c0_i32 = arith.constant 0 : i32
    return %arg0, %arg2 : i32, i32
  }
  func.func @transform_1(%arg0: i32, %arg1: i32, %arg2: i32) -> (i32, i32) {
    %c0_i32 = arith.constant 0 : i32
    return %arg2, %arg1 : i32, i32
  }
  func.func @transform_2(%arg0: i32, %arg1: i32, %arg2: i32) -> (i32, i32) {
    %c0_i32 = arith.constant 0 : i32
    %c0_i32_0 = arith.constant 0 : i32
    return %c0_i32, %arg1 : i32, i32
  }
  func.func @transform_3(%arg0: i32, %arg1: i32, %arg2: i32) -> (i32, i32) {
    %c0_i32 = arith.constant 0 : i32
    return %arg0, %arg1 : i32, i32
  }
}

module attributes {stable_mosaic.version = 11 : i64} {
  func.func @_linear_kernel(%arg0: i32, %arg1: i32, %arg2: i32, %arg3: memref<16x32xf32, #tpu.memory_space<vmem>>, %arg4: memref<32x32xbf16, #tpu.memory_space<vmem>>, %arg5: memref<1x32xf32, #tpu.memory_space<vmem>>, %arg6: memref<16x32xbf16, #tpu.memory_space<vmem>>, %arg7: memref<16x32xf32, #tpu.memory_space<vmem>>) attributes {dimension_semantics = [#tpu.dimension_semantics<parallel>, #tpu.dimension_semantics<parallel>, #tpu.dimension_semantics<arbitrary>], iteration_bounds = array<i64: 1, 1, 1>, scalar_prefetch = 0 : i64, scratch_operands = 1 : i64, tpu.core_type = #tpu.core_type<tc>, window_params = [{transform_indices = @transform_0, window_bounds = array<i64: 16, 32>}, {transform_indices = @transform_1, window_bounds = array<i64: 32, 32>}, {transform_indices = @transform_2, window_bounds = array<i64: 1, 32>}, {transform_indices = @transform_3, window_bounds = array<i64: 16, 32>}]} {
    %c0_i32 = arith.constant 0 : i32
    %0 = arith.cmpi eq, %arg2, %c0_i32 : i32
    %1 = arith.extui %0 : i1 to i32
    %c0_i32_0 = arith.constant 0 : i32
    %2 = arith.cmpi ne, %1, %c0_i32_0 : i32
    scf.if %2 {
      %cst_10 = arith.constant 0.000000e+00 : f32
      %13 = vector.broadcast %cst_10 : f32 to vector<16x32xf32>
      %c0_11 = arith.constant 0 : index
      %c0_12 = arith.constant 0 : index
      %14 = vector.load %arg7[%c0_11, %c0_12] : memref<16x32xf32, #tpu.memory_space<vmem>>, vector<16x32xf32>
      tpu.vector_store %arg7[%c0_11, %c0_12], %13 {strides = array<i32>} : memref<16x32xf32, #tpu.memory_space<vmem>>, vector<16x32xf32>,
    } else {
    }
    %c0 = arith.constant 0 : index
    %c0_1 = arith.constant 0 : index
    %3 = vector.load %arg7[%c0, %c0_1] : memref<16x32xf32, #tpu.memory_space<vmem>>, vector<16x32xf32>
    %c0_2 = arith.constant 0 : index
    %c0_3 = arith.constant 0 : index
    %4 = vector.load %arg3[%c0_2, %c0_3] : memref<16x32xf32, #tpu.memory_space<vmem>>, vector<16x32xf32>
    %5 = arith.truncf %4 : vector<16x32xf32> to vector<16x32xbf16>
    %c0_4 = arith.constant 0 : index
    %c0_5 = arith.constant 0 : index
    %6 = vector.load %arg4[%c0_4, %c0_5] : memref<32x32xbf16, #tpu.memory_space<vmem>>, vector<32x32xbf16>
    %cst = arith.constant dense<0.000000e+00> : vector<16x32xf32>
    %7 = tpu.matmul %5, %6, %cst {dimension_numbers = #tpu.dot_dimension_numbers<[1], [0], [0], [1], [0, 0, 1, 1], [], []>} : vector<16x32xbf16>, vector<32x32xbf16>, vector<16x32xf32> -> vector<16x32xf32>
    %8 = arith.addf %3, %7 : vector<16x32xf32>
    %c0_6 = arith.constant 0 : index
    %c0_7 = arith.constant 0 : index
    %9 = vector.load %arg7[%c0_6, %c0_7] : memref<16x32xf32, #tpu.memory_space<vmem>>, vector<16x32xf32>
    tpu.vector_store %arg7[%c0_6, %c0_7], %8 {strides = array<i32>} : memref<16x32xf32, #tpu.memory_space<vmem>>, vector<16x32xf32>,
    %c0_i32_8 = arith.constant 0 : i32
    %10 = arith.cmpi eq, %arg2, %c0_i32_8 : i32
    %11 = arith.extui %10 : i1 to i32
    %c0_i32_9 = arith.constant 0 : i32
    %12 = arith.cmpi ne, %11, %c0_i32_9 : i32
    scf.if %12 {
      %c0_10 = arith.constant 0 : index
      %c0_11 = arith.constant 0 : index
      %13 = vector.load %arg7[%c0_10, %c0_11] : memref<16x32xf32, #tpu.memory_space<vmem>>, vector<16x32xf32>
      %c0_12 = arith.constant 0 : index
      %c0_13 = arith.constant 0 : index
      %14 = vector.load %arg5[%c0_12, %c0_13] : memref<1x32xf32, #tpu.memory_space<vmem>>, vector<1x32xf32>
      %15 = vector.broadcast %14 : vector<1x32xf32> to vector<16x32xf32>
      %16 = arith.addf %13, %15 : vector<16x32xf32>
      %17 = arith.truncf %16 : vector<16x32xf32> to vector<16x32xbf16>
      %c0_14 = arith.constant 0 : index
      %c0_15 = arith.constant 0 : index
      %18 = vector.load %arg6[%c0_14, %c0_15] : memref<16x32xbf16, #tpu.memory_space<vmem>>, vector<16x32xbf16>
      tpu.vector_store %arg6[%c0_14, %c0_15], %17 {strides = array<i32>} : memref<16x32xbf16, #tpu.memory_space<vmem>>, vector<16x32xbf16>,
    } else {
    }
    return
  }
  func.func @transform_0(%arg0: i32, %arg1: i32, %arg2: i32) -> (i32, i32) {
    %c0_i32 = arith.constant 0 : i32
    return %arg0, %arg2 : i32, i32
  }
  func.func @transform_1(%arg0: i32, %arg1: i32, %arg2: i32) -> (i32, i32) {
    %c0_i32 = arith.constant 0 : i32
    return %arg2, %arg1 : i32, i32
  }
  func.func @transform_2(%arg0: i32, %arg1: i32, %arg2: i32) -> (i32, i32) {
    %c0_i32 = arith.constant 0 : i32
    %c0_i32_0 = arith.constant 0 : i32
    return %c0_i32, %arg1 : i32, i32
  }
  func.func @transform_3(%arg0: i32, %arg1: i32, %arg2: i32) -> (i32, i32) {
    %c0_i32 = arith.constant 0 : i32
    return %arg0, %arg1 : i32, i32
  }
}

module attributes {stable_mosaic.version = 11 : i64} {
  func.func @_linear_kernel(%arg0: i32, %arg1: i32, %arg2: i32, %arg3: memref<16x32xf32, #tpu.memory_space<vmem>>, %arg4: memref<32x32xbf16, #tpu.memory_space<vmem>>, %arg5: memref<1x32xf32, #tpu.memory_space<vmem>>, %arg6: memref<16x32xbf16, #tpu.memory_space<vmem>>, %arg7: memref<16x32xf32, #tpu.memory_space<vmem>>) attributes {dimension_semantics = [#tpu.dimension_semantics<parallel>, #tpu.dimension_semantics<parallel>, #tpu.dimension_semantics<arbitrary>], iteration_bounds = array<i64: 1, 1, 1>, scalar_prefetch = 0 : i64, scratch_operands = 1 : i64, tpu.core_type = #tpu.core_type<tc>, window_params = [{transform_indices = @transform_0, window_bounds = array<i64: 16, 32>}, {transform_indices = @transform_1, window_bounds = array<i64: 32, 32>}, {transform_indices = @transform_2, window_bounds = array<i64: 1, 32>}, {transform_indices = @transform_3, window_bounds = array<i64: 16, 32>}]} {
    %c0_i32 = arith.constant 0 : i32
    %0 = arith.cmpi eq, %arg2, %c0_i32 : i32
    %1 = arith.extui %0 : i1 to i32
    %c0_i32_0 = arith.constant 0 : i32
    %2 = arith.cmpi ne, %1, %c0_i32_0 : i32
    scf.if %2 {
      %cst_10 = arith.constant 0.000000e+00 : f32
      %13 = vector.broadcast %cst_10 : f32 to vector<16x32xf32>
      %c0_11 = arith.constant 0 : index
      %c0_12 = arith.constant 0 : index
      %14 = vector.load %arg7[%c0_11, %c0_12] : memref<16x32xf32, #tpu.memory_space<vmem>>, vector<16x32xf32>
      tpu.vector_store %arg7[%c0_11, %c0_12], %13 {strides = array<i32>} : memref<16x32xf32, #tpu.memory_space<vmem>>, vector<16x32xf32>,
    } else {
    }
    %c0 = arith.constant 0 : index
    %c0_1 = arith.constant 0 : index
    %3 = vector.load %arg7[%c0, %c0_1] : memref<16x32xf32, #tpu.memory_space<vmem>>, vector<16x32xf32>
    %c0_2 = arith.constant 0 : index
    %c0_3 = arith.constant 0 : index
    %4 = vector.load %arg3[%c0_2, %c0_3] : memref<16x32xf32, #tpu.memory_space<vmem>>, vector<16x32xf32>
    %5 = arith.truncf %4 : vector<16x32xf32> to vector<16x32xbf16>
    %c0_4 = arith.constant 0 : index
    %c0_5 = arith.constant 0 : index
    %6 = vector.load %arg4[%c0_4, %c0_5] : memref<32x32xbf16, #tpu.memory_space<vmem>>, vector<32x32xbf16>
    %cst = arith.constant dense<0.000000e+00> : vector<16x32xf32>
    %7 = tpu.matmul %5, %6, %cst {dimension_numbers = #tpu.dot_dimension_numbers<[1], [0], [0], [1], [0, 0, 1, 1], [], []>} : vector<16x32xbf16>, vector<32x32xbf16>, vector<16x32xf32> -> vector<16x32xf32>
    %8 = arith.addf %3, %7 : vector<16x32xf32>
    %c0_6 = arith.constant 0 : index
    %c0_7 = arith.constant 0 : index
    %9 = vector.load %arg7[%c0_6, %c0_7] : memref<16x32xf32, #tpu.memory_space<vmem>>, vector<16x32xf32>
    tpu.vector_store %arg7[%c0_6, %c0_7], %8 {strides = array<i32>} : memref<16x32xf32, #tpu.memory_space<vmem>>, vector<16x32xf32>,
    %c0_i32_8 = arith.constant 0 : i32
    %10 = arith.cmpi eq, %arg2, %c0_i32_8 : i32
    %11 = arith.extui %10 : i1 to i32
    %c0_i32_9 = arith.constant 0 : i32
    %12 = arith.cmpi ne, %11, %c0_i32_9 : i32
    scf.if %12 {
      %c0_10 = arith.constant 0 : index
      %c0_11 = arith.constant 0 : index
      %13 = vector.load %arg7[%c0_10, %c0_11] : memref<16x32xf32, #tpu.memory_space<vmem>>, vector<16x32xf32>
      %c0_12 = arith.constant 0 : index
      %c0_13 = arith.constant 0 : index
      %14 = vector.load %arg5[%c0_12, %c0_13] : memref<1x32xf32, #tpu.memory_space<vmem>>, vector<1x32xf32>
      %15 = vector.broadcast %14 : vector<1x32xf32> to vector<16x32xf32>
      %16 = arith.addf %13, %15 : vector<16x32xf32>
      %17 = arith.truncf %16 : vector<16x32xf32> to vector<16x32xbf16>
      %c0_14 = arith.constant 0 : index
      %c0_15 = arith.constant 0 : index
      %18 = vector.load %arg6[%c0_14, %c0_15] : memref<16x32xbf16, #tpu.memory_space<vmem>>, vector<16x32xbf16>
      tpu.vector_store %arg6[%c0_14, %c0_15], %17 {strides = array<i32>} : memref<16x32xbf16, #tpu.memory_space<vmem>>, vector<16x32xbf16>,
    } else {
    }
    return
  }
  func.func @transform_0(%arg0: i32, %arg1: i32, %arg2: i32) -> (i32, i32) {
    %c0_i32 = arith.constant 0 : i32
    return %arg0, %arg2 : i32, i32
  }
  func.func @transform_1(%arg0: i32, %arg1: i32, %arg2: i32) -> (i32, i32) {
    %c0_i32 = arith.constant 0 : i32
    return %arg2, %arg1 : i32, i32
  }
  func.func @transform_2(%arg0: i32, %arg1: i32, %arg2: i32) -> (i32, i32) {
    %c0_i32 = arith.constant 0 : i32
    %c0_i32_0 = arith.constant 0 : i32
    return %c0_i32, %arg1 : i32, i32
  }
  func.func @transform_3(%arg0: i32, %arg1: i32, %arg2: i32) -> (i32, i32) {
    %c0_i32 = arith.constant 0 : i32
    return %arg0, %arg1 : i32, i32
  }
}

module attributes {stable_mosaic.version = 11 : i64} {
  func.func @_mha_lse_kernel(%arg0: i32, %arg1: i32, %arg2: i32, %arg3: memref<1x8x32xbf16, #tpu.memory_space<vmem>>, %arg4: memref<1x8x32xbf16, #tpu.memory_space<vmem>>, %arg5: memref<1x8x4xf32, #tpu.memory_space<vmem>>, %arg6: memref<8x4xf32, #tpu.memory_space<vmem>>, %arg7: memref<8x4xf32, #tpu.memory_space<vmem>>) attributes {dimension_semantics = [#tpu.dimension_semantics<parallel>, #tpu.dimension_semantics<parallel>, #tpu.dimension_semantics<arbitrary>], iteration_bounds = array<i64: 2, 1, 1>, scalar_prefetch = 0 : i64, scratch_operands = 2 : i64, tpu.core_type = #tpu.core_type<tc>, window_params = [{transform_indices = @transform_0, window_bounds = array<i64: 1, 8, 32>}, {transform_indices = @transform_1, window_bounds = array<i64: 1, 8, 32>}, {transform_indices = @transform_2, window_bounds = array<i64: 1, 8, 4>}]} {
    %c0_i32 = arith.constant 0 : i32
    %0 = arith.cmpi eq, %arg2, %c0_i32 : i32
    %1 = arith.extui %0 : i1 to i32
    %c0_i32_0 = arith.constant 0 : i32
    %2 = arith.cmpi ne, %1, %c0_i32_0 : i32
    scf.if %2 {
      %cst_48 = arith.constant 0xFF800000 : f32
      %86 = vector.broadcast %cst_48 : f32 to vector<8x4xf32>
      %c0_49 = arith.constant 0 : index
      %c0_50 = arith.constant 0 : index
      %87 = vector.load %arg6[%c0_49, %c0_50] : memref<8x4xf32, #tpu.memory_space<vmem>>, vector<8x4xf32>
      tpu.vector_store %arg6[%c0_49, %c0_50], %86 {strides = array<i32>} : memref<8x4xf32, #tpu.memory_space<vmem>>, vector<8x4xf32>,
      %cst_51 = arith.constant 0.000000e+00 : f32
      %88 = vector.broadcast %cst_51 : f32 to vector<8x4xf32>
      %c0_52 = arith.constant 0 : index
      %c0_53 = arith.constant 0 : index
      %89 = vector.load %arg7[%c0_52, %c0_53] : memref<8x4xf32, #tpu.memory_space<vmem>>, vector<8x4xf32>
      tpu.vector_store %arg7[%c0_52, %c0_53], %88 {strides = array<i32>} : memref<8x4xf32, #tpu.memory_space<vmem>>, vector<8x4xf32>,
    } else {
    }
    %c0 = arith.constant 0 : index
    %c0_1 = arith.constant 0 : index
    %c0_2 = arith.constant 0 : index
    %3 = vector.load %arg3[%c0, %c0_1, %c0_2] : memref<1x8x32xbf16, #tpu.memory_space<vmem>>, vector<1x8x32xbf16>
    %4 = vector.shape_cast %3 : vector<1x8x32xbf16> to vector<8x32xbf16>
    %c0_3 = arith.constant 0 : index
    %c0_4 = arith.constant 0 : index
    %c0_5 = arith.constant 0 : index
    %5 = vector.load %arg4[%c0_3, %c0_4, %c0_5] : memref<1x8x32xbf16, #tpu.memory_space<vmem>>, vector<1x8x32xbf16>
    %6 = vector.shape_cast %5 : vector<1x8x32xbf16> to vector<8x32xbf16>
    %7 = vector.extract_strided_slice %4 {offsets = [0, 0], sizes = [8, 8], strides = [1, 1]} : vector<8x32xbf16> to vector<8x8xbf16>
    %8 = vector.extract_strided_slice %6 {offsets = [0, 0], sizes = [8, 8], strides = [1, 1]} : vector<8x32xbf16> to vector<8x8xbf16>
    %cst = arith.constant dense<0.000000e+00> : vector<8x8xf32>
    %9 = tpu.matmul %7, %8, %cst {dimension_numbers = #tpu.dot_dimension_numbers<[1], [1], [0], [0], [0, 0, 1, 0], [], []>} : vector<8x8xbf16>, vector<8x8xbf16>, vector<8x8xf32> -> vector<8x8xf32>
    %c0_6 = arith.constant 0 : index
    %c0_7 = arith.constant 0 : index
    %10 = vector.load %arg6[%c0_6, %c0_7] : memref<8x4xf32, #tpu.memory_space<vmem>>, vector<8x1xf32>
    %cst_8 = arith.constant dense<0xFF800000> : vector<8xf32>
    %11 = vector.multi_reduction <maximumf>, %9, %cst_8 [1] : vector<8x8xf32> to vector<8xf32>
    %12 = vector.shape_cast %11 : vector<8xf32> to vector<8x1xf32>
    %13 = arith.maximumf %10, %12 : vector<8x1xf32>
    %c0_9 = arith.constant 0 : index
    %c0_10 = arith.constant 0 : index
    %14 = vector.load %arg7[%c0_9, %c0_10] : memref<8x4xf32, #tpu.memory_space<vmem>>, vector<8x1xf32>
    %15 = arith.subf %10, %13 : vector<8x1xf32>
    %16 = math.exp %15 : vector<8x1xf32>
    %17 = arith.mulf %14, %16 : vector<8x1xf32>
    %18 = vector.broadcast %13 : vector<8x1xf32> to vector<8x8xf32>
    %19 = arith.subf %9, %18 : vector<8x8xf32>
    %20 = math.exp %19 : vector<8x8xf32>
    %cst_11 = arith.constant dense<0.000000e+00> : vector<8xf32>
    %21 = vector.multi_reduction <add>, %20, %cst_11 [1] : vector<8x8xf32> to vector<8xf32>
    %22 = vector.shape_cast %21 : vector<8xf32> to vector<8x1xf32>
    %23 = arith.addf %17, %22 : vector<8x1xf32>
    %c0_12 = arith.constant 0 : index
    %c0_13 = arith.constant 0 : index
    %24 = vector.load %arg6[%c0_12, %c0_13] : memref<8x4xf32, #tpu.memory_space<vmem>>, vector<8x1xf32>
    tpu.vector_store %arg6[%c0_12, %c0_13], %13 {strides = array<i32>} : memref<8x4xf32, #tpu.memory_space<vmem>>, vector<8x1xf32>,
    %c0_14 = arith.constant 0 : index
    %c0_15 = arith.constant 0 : index
    %25 = vector.load %arg7[%c0_14, %c0_15] : memref<8x4xf32, #tpu.memory_space<vmem>>, vector<8x1xf32>
    tpu.vector_store %arg7[%c0_14, %c0_15], %23 {strides = array<i32>} : memref<8x4xf32, #tpu.memory_space<vmem>>, vector<8x1xf32>,
    %26 = vector.extract_strided_slice %4 {offsets = [0, 8], sizes = [8, 8], strides = [1, 1]} : vector<8x32xbf16> to vector<8x8xbf16>
    %27 = vector.extract_strided_slice %6 {offsets = [0, 8], sizes = [8, 8], strides = [1, 1]} : vector<8x32xbf16> to vector<8x8xbf16>
    %cst_16 = arith.constant dense<0.000000e+00> : vector<8x8xf32>
    %28 = tpu.matmul %26, %27, %cst_16 {dimension_numbers = #tpu.dot_dimension_numbers<[1], [1], [0], [0], [0, 0, 1, 0], [], []>} : vector<8x8xbf16>, vector<8x8xbf16>, vector<8x8xf32> -> vector<8x8xf32>
    %c0_17 = arith.constant 0 : index
    %c1 = arith.constant 1 : index
    %29 = vector.load %arg6[%c0_17, %c1] : memref<8x4xf32, #tpu.memory_space<vmem>>, vector<8x1xf32>
    %cst_18 = arith.constant dense<0xFF800000> : vector<8xf32>
    %30 = vector.multi_reduction <maximumf>, %28, %cst_18 [1] : vector<8x8xf32> to vector<8xf32>
    %31 = vector.shape_cast %30 : vector<8xf32> to vector<8x1xf32>
    %32 = arith.maximumf %29, %31 : vector<8x1xf32>
    %c0_19 = arith.constant 0 : index
    %c1_20 = arith.constant 1 : index
    %33 = vector.load %arg7[%c0_19, %c1_20] : memref<8x4xf32, #tpu.memory_space<vmem>>, vector<8x1xf32>
    %34 = arith.subf %29, %32 : vector<8x1xf32>
    %35 = math.exp %34 : vector<8x1xf32>
    %36 = arith.mulf %33, %35 : vector<8x1xf32>
    %37 = vector.broadcast %32 : vector<8x1xf32> to vector<8x8xf32>
    %38 = arith.subf %28, %37 : vector<8x8xf32>
    %39 = math.exp %38 : vector<8x8xf32>
    %cst_21 = arith.constant dense<0.000000e+00> : vector<8xf32>
    %40 = vector.multi_reduction <add>, %39, %cst_21 [1] : vector<8x8xf32> to vector<8xf32>
    %41 = vector.shape_cast %40 : vector<8xf32> to vector<8x1xf32>
    %42 = arith.addf %36, %41 : vector<8x1xf32>
    %c0_22 = arith.constant 0 : index
    %c1_23 = arith.constant 1 : index
    %43 = vector.load %arg6[%c0_22, %c1_23] : memref<8x4xf32, #tpu.memory_space<vmem>>, vector<8x1xf32>
    tpu.vector_store %arg6[%c0_22, %c1_23], %32 {strides = array<i32>} : memref<8x4xf32, #tpu.memory_space<vmem>>, vector<8x1xf32>,
    %c0_24 = arith.constant 0 : index
    %c1_25 = arith.constant 1 : index
    %44 = vector.load %arg7[%c0_24, %c1_25] : memref<8x4xf32, #tpu.memory_space<vmem>>, vector<8x1xf32>
    tpu.vector_store %arg7[%c0_24, %c1_25], %42 {strides = array<i32>} : memref<8x4xf32, #tpu.memory_space<vmem>>, vector<8x1xf32>,
    %45 = vector.extract_strided_slice %4 {offsets = [0, 16], sizes = [8, 8], strides = [1, 1]} : vector<8x32xbf16> to vector<8x8xbf16>
    %46 = vector.extract_strided_slice %6 {offsets = [0, 16], sizes = [8, 8], strides = [1, 1]} : vector<8x32xbf16> to vector<8x8xbf16>
    %cst_26 = arith.constant dense<0.000000e+00> : vector<8x8xf32>
    %47 = tpu.matmul %45, %46, %cst_26 {dimension_numbers = #tpu.dot_dimension_numbers<[1], [1], [0], [0], [0, 0, 1, 0], [], []>} : vector<8x8xbf16>, vector<8x8xbf16>, vector<8x8xf32> -> vector<8x8xf32>
    %c0_27 = arith.constant 0 : index
    %c2 = arith.constant 2 : index
    %48 = vector.load %arg6[%c0_27, %c2] : memref<8x4xf32, #tpu.memory_space<vmem>>, vector<8x1xf32>
    %cst_28 = arith.constant dense<0xFF800000> : vector<8xf32>
    %49 = vector.multi_reduction <maximumf>, %47, %cst_28 [1] : vector<8x8xf32> to vector<8xf32>
    %50 = vector.shape_cast %49 : vector<8xf32> to vector<8x1xf32>
    %51 = arith.maximumf %48, %50 : vector<8x1xf32>
    %c0_29 = arith.constant 0 : index
    %c2_30 = arith.constant 2 : index
    %52 = vector.load %arg7[%c0_29, %c2_30] : memref<8x4xf32, #tpu.memory_space<vmem>>, vector<8x1xf32>
    %53 = arith.subf %48, %51 : vector<8x1xf32>
    %54 = math.exp %53 : vector<8x1xf32>
    %55 = arith.mulf %52, %54 : vector<8x1xf32>
    %56 = vector.broadcast %51 : vector<8x1xf32> to vector<8x8xf32>
    %57 = arith.subf %47, %56 : vector<8x8xf32>
    %58 = math.exp %57 : vector<8x8xf32>
    %cst_31 = arith.constant dense<0.000000e+00> : vector<8xf32>
    %59 = vector.multi_reduction <add>, %58, %cst_31 [1] : vector<8x8xf32> to vector<8xf32>
    %60 = vector.shape_cast %59 : vector<8xf32> to vector<8x1xf32>
    %61 = arith.addf %55, %60 : vector<8x1xf32>
    %c0_32 = arith.constant 0 : index
    %c2_33 = arith.constant 2 : index
    %62 = vector.load %arg6[%c0_32, %c2_33] : memref<8x4xf32, #tpu.memory_space<vmem>>, vector<8x1xf32>
    tpu.vector_store %arg6[%c0_32, %c2_33], %51 {strides = array<i32>} : memref<8x4xf32, #tpu.memory_space<vmem>>, vector<8x1xf32>,
    %c0_34 = arith.constant 0 : index
    %c2_35 = arith.constant 2 : index
    %63 = vector.load %arg7[%c0_34, %c2_35] : memref<8x4xf32, #tpu.memory_space<vmem>>, vector<8x1xf32>
    tpu.vector_store %arg7[%c0_34, %c2_35], %61 {strides = array<i32>} : memref<8x4xf32, #tpu.memory_space<vmem>>, vector<8x1xf32>,
    %64 = vector.extract_strided_slice %4 {offsets = [0, 24], sizes = [8, 8], strides = [1, 1]} : vector<8x32xbf16> to vector<8x8xbf16>
    %65 = vector.extract_strided_slice %6 {offsets = [0, 24], sizes = [8, 8], strides = [1, 1]} : vector<8x32xbf16> to vector<8x8xbf16>
    %cst_36 = arith.constant dense<0.000000e+00> : vector<8x8xf32>
    %66 = tpu.matmul %64, %65, %cst_36 {dimension_numbers = #tpu.dot_dimension_numbers<[1], [1], [0], [0], [0, 0, 1, 0], [], []>} : vector<8x8xbf16>, vector<8x8xbf16>, vector<8x8xf32> -> vector<8x8xf32>
    %c0_37 = arith.constant 0 : index
    %c3 = arith.constant 3 : index
    %67 = vector.load %arg6[%c0_37, %c3] : memref<8x4xf32, #tpu.memory_space<vmem>>, vector<8x1xf32>
    %cst_38 = arith.constant dense<0xFF800000> : vector<8xf32>
    %68 = vector.multi_reduction <maximumf>, %66, %cst_38 [1] : vector<8x8xf32> to vector<8xf32>
    %69 = vector.shape_cast %68 : vector<8xf32> to vector<8x1xf32>
    %70 = arith.maximumf %67, %69 : vector<8x1xf32>
    %c0_39 = arith.constant 0 : index
    %c3_40 = arith.constant 3 : index
    %71 = vector.load %arg7[%c0_39, %c3_40] : memref<8x4xf32, #tpu.memory_space<vmem>>, vector<8x1xf32>
    %72 = arith.subf %67, %70 : vector<8x1xf32>
    %73 = math.exp %72 : vector<8x1xf32>
    %74 = arith.mulf %71, %73 : vector<8x1xf32>
    %75 = vector.broadcast %70 : vector<8x1xf32> to vector<8x8xf32>
    %76 = arith.subf %66, %75 : vector<8x8xf32>
    %77 = math.exp %76 : vector<8x8xf32>
    %cst_41 = arith.constant dense<0.000000e+00> : vector<8xf32>
    %78 = vector.multi_reduction <add>, %77, %cst_41 [1] : vector<8x8xf32> to vector<8xf32>
    %79 = vector.shape_cast %78 : vector<8xf32> to vector<8x1xf32>
    %80 = arith.addf %74, %79 : vector<8x1xf32>
    %c0_42 = arith.constant 0 : index
    %c3_43 = arith.constant 3 : index
    %81 = vector.load %arg6[%c0_42, %c3_43] : memref<8x4xf32, #tpu.memory_space<vmem>>, vector<8x1xf32>
    tpu.vector_store %arg6[%c0_42, %c3_43], %70 {strides = array<i32>} : memref<8x4xf32, #tpu.memory_space<vmem>>, vector<8x1xf32>,
    %c0_44 = arith.constant 0 : index
    %c3_45 = arith.constant 3 : index
    %82 = vector.load %arg7[%c0_44, %c3_45] : memref<8x4xf32, #tpu.memory_space<vmem>>, vector<8x1xf32>
    tpu.vector_store %arg7[%c0_44, %c3_45], %80 {strides = array<i32>} : memref<8x4xf32, #tpu.memory_space<vmem>>, vector<8x1xf32>,
    %c0_i32_46 = arith.constant 0 : i32
    %83 = arith.cmpi eq, %arg2, %c0_i32_46 : i32
    %84 = arith.extui %83 : i1 to i32
    %c0_i32_47 = arith.constant 0 : i32
    %85 = arith.cmpi ne, %84, %c0_i32_47 : i32
    scf.if %85 {
      %c0_48 = arith.constant 0 : index
      %c0_49 = arith.constant 0 : index
      %86 = vector.load %arg6[%c0_48, %c0_49] : memref<8x4xf32, #tpu.memory_space<vmem>>, vector<8x4xf32>
      %c0_50 = arith.constant 0 : index
      %c0_51 = arith.constant 0 : index
      %87 = vector.load %arg7[%c0_50, %c0_51] : memref<8x4xf32, #tpu.memory_space<vmem>>, vector<8x4xf32>
      %88 = math.log %87 : vector<8x4xf32>
      %89 = arith.addf %86, %88 : vector<8x4xf32>
      %c0_52 = arith.constant 0 : index
      %c0_53 = arith.constant 0 : index
      %c0_54 = arith.constant 0 : index
      %90 = vector.load %arg5[%c0_52, %c0_53, %c0_54] : memref<1x8x4xf32, #tpu.memory_space<vmem>>, vector<1x8x4xf32>
      %91 = vector.shape_cast %90 : vector<1x8x4xf32> to vector<8x4xf32>
      %92 = vector.shape_cast %89 : vector<8x4xf32> to vector<1x8x4xf32>
      tpu.vector_store %arg5[%c0_52, %c0_53, %c0_54], %92 {strides = array<i32>} : memref<1x8x4xf32, #tpu.memory_space<vmem>>, vector<1x8x4xf32>,
    } else {
    }
    return
  }
  func.func @transform_0(%arg0: i32, %arg1: i32, %arg2: i32) -> (i32, i32, i32) {
    %c0_i32 = arith.constant 0 : i32
    %c0_i32_0 = arith.constant 0 : i32
    return %arg0, %arg1, %c0_i32 : i32, i32, i32
  }
  func.func @transform_1(%arg0: i32, %arg1: i32, %arg2: i32) -> (i32, i32, i32) {
    %c0_i32 = arith.constant 0 : i32
    %c0_i32_0 = arith.constant 0 : i32
    return %arg0, %arg2, %c0_i32 : i32, i32, i32
  }
  func.func @transform_2(%arg0: i32, %arg1: i32, %arg2: i32) -> (i32, i32, i32) {
    %c0_i32 = arith.constant 0 : i32
    %c0_i32_0 = arith.constant 0 : i32
    return %arg0, %arg1, %c0_i32 : i32, i32, i32
  }
}

module attributes {stable_mosaic.version = 11 : i64} {
  func.func @_mha_out_kernel(%arg0: i32, %arg1: i32, %arg2: i32, %arg3: memref<1x8x32xbf16, #tpu.memory_space<vmem>>, %arg4: memref<1x8x32xbf16, #tpu.memory_space<vmem>>, %arg5: memref<1x8x32xbf16, #tpu.memory_space<vmem>>, %arg6: memref<1x8x4xf32, #tpu.memory_space<vmem>>, %arg7: memref<32x32xbf16, #tpu.memory_space<vmem>>, %arg8: memref<1x32xf32, #tpu.memory_space<vmem>>, %arg9: memref<1x8x32xf32, #tpu.memory_space<vmem>>, %arg10: memref<1x4x8x8xf32, #tpu.memory_space<vmem>>, %arg11: memref<8x32xf32, #tpu.memory_space<vmem>>) attributes {dimension_semantics = [#tpu.dimension_semantics<parallel>, #tpu.dimension_semantics<parallel>, #tpu.dimension_semantics<arbitrary>], iteration_bounds = array<i64: 2, 1, 1>, scalar_prefetch = 0 : i64, scratch_operands = 1 : i64, tpu.core_type = #tpu.core_type<tc>, window_params = [{transform_indices = @transform_0, window_bounds = array<i64: 1, 8, 32>}, {transform_indices = @transform_1, window_bounds = array<i64: 1, 8, 32>}, {transform_indices = @transform_2, window_bounds = array<i64: 1, 8, 32>}, {transform_indices = @transform_3, window_bounds = array<i64: 1, 8, 4>}, {pipeline_mode = #tpu.pipeline_mode<synchronous>, transform_indices = @transform_4, window_bounds = array<i64: 32, 32>}, {pipeline_mode = #tpu.pipeline_mode<synchronous>, transform_indices = @transform_5, window_bounds = array<i64: 1, 32>}, {transform_indices = @transform_6, window_bounds = array<i64: 1, 8, 32>}, {transform_indices = @transform_7, window_bounds = array<i64: 1, 4, 8, 8>}]} {
    %c0_i32 = arith.constant 0 : i32
    %0 = arith.cmpi eq, %arg2, %c0_i32 : i32
    %1 = arith.extui %0 : i1 to i32
    %c0_i32_0 = arith.constant 0 : i32
    %2 = arith.cmpi ne, %1, %c0_i32_0 : i32
    scf.if %2 {
      %cst_47 = arith.constant 0.000000e+00 : f32
      %78 = vector.broadcast %cst_47 : f32 to vector<8x32xf32>
      %c0_48 = arith.constant 0 : index
      %c0_49 = arith.constant 0 : index
      %79 = vector.load %arg11[%c0_48, %c0_49] : memref<8x32xf32, #tpu.memory_space<vmem>>, vector<8x32xf32>
      tpu.vector_store %arg11[%c0_48, %c0_49], %78 {strides = array<i32>} : memref<8x32xf32, #tpu.memory_space<vmem>>, vector<8x32xf32>,
    } else {
    }
    %c0 = arith.constant 0 : index
    %c0_1 = arith.constant 0 : index
    %c0_2 = arith.constant 0 : index
    %3 = vector.load %arg3[%c0, %c0_1, %c0_2] : memref<1x8x32xbf16, #tpu.memory_space<vmem>>, vector<1x8x32xbf16>
    %4 = vector.shape_cast %3 : vector<1x8x32xbf16> to vector<8x32xbf16>
    %c0_3 = arith.constant 0 : index
    %c0_4 = arith.constant 0 : index
    %c0_5 = arith.constant 0 : index
    %5 = vector.load %arg4[%c0_3, %c0_4, %c0_5] : memref<1x8x32xbf16, #tpu.memory_space<vmem>>, vector<1x8x32xbf16>
    %6 = vector.shape_cast %5 : vector<1x8x32xbf16> to vector<8x32xbf16>
    %c0_6 = arith.constant 0 : index
    %c0_7 = arith.constant 0 : index
    %c0_8 = arith.constant 0 : index
    %7 = vector.load %arg5[%c0_6, %c0_7, %c0_8] : memref<1x8x32xbf16, #tpu.memory_space<vmem>>, vector<1x8x32xbf16>
    %8 = vector.shape_cast %7 : vector<1x8x32xbf16> to vector<8x32xbf16>
    %c0_9 = arith.constant 0 : index
    %c0_10 = arith.constant 0 : index
    %c0_11 = arith.constant 0 : index
    %9 = vector.load %arg6[%c0_9, %c0_10, %c0_11] : memref<1x8x4xf32, #tpu.memory_space<vmem>>, vector<1x8x4xf32>
    %10 = vector.shape_cast %9 : vector<1x8x4xf32> to vector<8x4xf32>
    %11 = vector.extract_strided_slice %4 {offsets = [0, 0], sizes = [8, 8], strides = [1, 1]} : vector<8x32xbf16> to vector<8x8xbf16>
    %12 = vector.extract_strided_slice %6 {offsets = [0, 0], sizes = [8, 8], strides = [1, 1]} : vector<8x32xbf16> to vector<8x8xbf16>
    %13 = vector.extract_strided_slice %8 {offsets = [0, 0], sizes = [8, 8], strides = [1, 1]} : vector<8x32xbf16> to vector<8x8xbf16>
    %cst = arith.constant dense<0.000000e+00> : vector<8x8xf32>
    %14 = tpu.matmul %11, %12, %cst {dimension_numbers = #tpu.dot_dimension_numbers<[1], [1], [0], [0], [0, 0, 1, 0], [], []>} : vector<8x8xbf16>, vector<8x8xbf16>, vector<8x8xf32> -> vector<8x8xf32>
    %15 = vector.extract_strided_slice %10 {offsets = [0, 0], sizes = [8, 1], strides = [1, 1]} : vector<8x4xf32> to vector<8x1xf32>
    %16 = vector.broadcast %15 : vector<8x1xf32> to vector<8x8xf32>
    %17 = arith.subf %14, %16 : vector<8x8xf32>
    %18 = math.exp %17 : vector<8x8xf32>
    %c0_12 = arith.constant 0 : index
    %c0_13 = arith.constant 0 : index
    %c0_14 = arith.constant 0 : index
    %c0_15 = arith.constant 0 : index
    %19 = vector.load %arg10[%c0_12, %c0_13, %c0_14, %c0_15] : memref<1x4x8x8xf32, #tpu.memory_space<vmem>>, vector<1x1x8x8xf32>
    %20 = vector.shape_cast %19 : vector<1x1x8x8xf32> to vector<8x8xf32>
    %21 = vector.shape_cast %18 : vector<8x8xf32> to vector<1x1x8x8xf32>
    tpu.vector_store %arg10[%c0_12, %c0_13, %c0_14, %c0_15], %21 {strides = array<i32>} : memref<1x4x8x8xf32, #tpu.memory_space<vmem>>, vector<1x1x8x8xf32>,
    %c0_16 = arith.constant 0 : index
    %c0_17 = arith.constant 0 : index
    %22 = vector.load %arg11[%c0_16, %c0_17] : memref<8x32xf32, #tpu.memory_space<vmem>>, vector<8x8xf32>
    %23 = arith.truncf %18 : vector<8x8xf32> to vector<8x8xbf16>
    %cst_18 = arith.constant dense<0.000000e+00> : vector<8x8xf32>
    %24 = tpu.matmul %23, %13, %cst_18 {dimension_numbers = #tpu.dot_dimension_numbers<[1], [0], [0], [1], [0, 0, 1, 1], [], []>} : vector<8x8xbf16>, vector<8x8xbf16>, vector<8x8xf32> -> vector<8x8xf32>
    %25 = arith.addf %22, %24 : vector<8x8xf32>
    %c0_19 = arith.constant 0 : index
    %c0_20 = arith.constant 0 : index
    %26 = vector.load %arg11[%c0_19, %c0_20] : memref<8x32xf32, #tpu.memory_space<vmem>>, vector<8x8xf32>
    tpu.vector_store %arg11[%c0_19, %c0_20], %25 {strides = array<i32>} : memref<8x32xf32, #tpu.memory_space<vmem>>, vector<8x8xf32>,
    %27 = vector.extract_strided_slice %4 {offsets = [0, 8], sizes = [8, 8], strides = [1, 1]} : vector<8x32xbf16> to vector<8x8xbf16>
    %28 = vector.extract_strided_slice %6 {offsets = [0, 8], sizes = [8, 8], strides = [1, 1]} : vector<8x32xbf16> to vector<8x8xbf16>
    %29 = vector.extract_strided_slice %8 {offsets = [0, 8], sizes = [8, 8], strides = [1, 1]} : vector<8x32xbf16> to vector<8x8xbf16>
    %cst_21 = arith.constant dense<0.000000e+00> : vector<8x8xf32>
    %30 = tpu.matmul %27, %28, %cst_21 {dimension_numbers = #tpu.dot_dimension_numbers<[1], [1], [0], [0], [0, 0, 1, 0], [], []>} : vector<8x8xbf16>, vector<8x8xbf16>, vector<8x8xf32> -> vector<8x8xf32>
    %31 = vector.extract_strided_slice %10 {offsets = [0, 1], sizes = [8, 1], strides = [1, 1]} : vector<8x4xf32> to vector<8x1xf32>
    %32 = vector.broadcast %31 : vector<8x1xf32> to vector<8x8xf32>
    %33 = arith.subf %30, %32 : vector<8x8xf32>
    %34 = math.exp %33 : vector<8x8xf32>
    %c0_22 = arith.constant 0 : index
    %c1 = arith.constant 1 : index
    %c0_23 = arith.constant 0 : index
    %c0_24 = arith.constant 0 : index
    %35 = vector.load %arg10[%c0_22, %c1, %c0_23, %c0_24] : memref<1x4x8x8xf32, #tpu.memory_space<vmem>>, vector<1x1x8x8xf32>
    %36 = vector.shape_cast %35 : vector<1x1x8x8xf32> to vector<8x8xf32>
    %37 = vector.shape_cast %34 : vector<8x8xf32> to vector<1x1x8x8xf32>
    tpu.vector_store %arg10[%c0_22, %c1, %c0_23, %c0_24], %37 {strides = array<i32>} : memref<1x4x8x8xf32, #tpu.memory_space<vmem>>, vector<1x1x8x8xf32>,
    %c0_25 = arith.constant 0 : index
    %c8 = arith.constant 8 : index
    %38 = vector.load %arg11[%c0_25, %c8] : memref<8x32xf32, #tpu.memory_space<vmem>>, vector<8x8xf32>
    %39 = arith.truncf %34 : vector<8x8xf32> to vector<8x8xbf16>
    %cst_26 = arith.constant dense<0.000000e+00> : vector<8x8xf32>
    %40 = tpu.matmul %39, %29, %cst_26 {dimension_numbers = #tpu.dot_dimension_numbers<[1], [0], [0], [1], [0, 0, 1, 1], [], []>} : vector<8x8xbf16>, vector<8x8xbf16>, vector<8x8xf32> -> vector<8x8xf32>
    %41 = arith.addf %38, %40 : vector<8x8xf32>
    %c0_27 = arith.constant 0 : index
    %c8_28 = arith.constant 8 : index
    %42 = vector.load %arg11[%c0_27, %c8_28] : memref<8x32xf32, #tpu.memory_space<vmem>>, vector<8x8xf32>
    tpu.vector_store %arg11[%c0_27, %c8_28], %41 {strides = array<i32>} : memref<8x32xf32, #tpu.memory_space<vmem>>, vector<8x8xf32>,
    %43 = vector.extract_strided_slice %4 {offsets = [0, 16], sizes = [8, 8], strides = [1, 1]} : vector<8x32xbf16> to vector<8x8xbf16>
    %44 = vector.extract_strided_slice %6 {offsets = [0, 16], sizes = [8, 8], strides = [1, 1]} : vector<8x32xbf16> to vector<8x8xbf16>
    %45 = vector.extract_strided_slice %8 {offsets = [0, 16], sizes = [8, 8], strides = [1, 1]} : vector<8x32xbf16> to vector<8x8xbf16>
    %cst_29 = arith.constant dense<0.000000e+00> : vector<8x8xf32>
    %46 = tpu.matmul %43, %44, %cst_29 {dimension_numbers = #tpu.dot_dimension_numbers<[1], [1], [0], [0], [0, 0, 1, 0], [], []>} : vector<8x8xbf16>, vector<8x8xbf16>, vector<8x8xf32> -> vector<8x8xf32>
    %47 = vector.extract_strided_slice %10 {offsets = [0, 2], sizes = [8, 1], strides = [1, 1]} : vector<8x4xf32> to vector<8x1xf32>
    %48 = vector.broadcast %47 : vector<8x1xf32> to vector<8x8xf32>
    %49 = arith.subf %46, %48 : vector<8x8xf32>
    %50 = math.exp %49 : vector<8x8xf32>
    %c0_30 = arith.constant 0 : index
    %c2 = arith.constant 2 : index
    %c0_31 = arith.constant 0 : index
    %c0_32 = arith.constant 0 : index
    %51 = vector.load %arg10[%c0_30, %c2, %c0_31, %c0_32] : memref<1x4x8x8xf32, #tpu.memory_space<vmem>>, vector<1x1x8x8xf32>
    %52 = vector.shape_cast %51 : vector<1x1x8x8xf32> to vector<8x8xf32>
    %53 = vector.shape_cast %50 : vector<8x8xf32> to vector<1x1x8x8xf32>
    tpu.vector_store %arg10[%c0_30, %c2, %c0_31, %c0_32], %53 {strides = array<i32>} : memref<1x4x8x8xf32, #tpu.memory_space<vmem>>, vector<1x1x8x8xf32>,
    %c0_33 = arith.constant 0 : index
    %c16 = arith.constant 16 : index
    %54 = vector.load %arg11[%c0_33, %c16] : memref<8x32xf32, #tpu.memory_space<vmem>>, vector<8x8xf32>
    %55 = arith.truncf %50 : vector<8x8xf32> to vector<8x8xbf16>
    %cst_34 = arith.constant dense<0.000000e+00> : vector<8x8xf32>
    %56 = tpu.matmul %55, %45, %cst_34 {dimension_numbers = #tpu.dot_dimension_numbers<[1], [0], [0], [1], [0, 0, 1, 1], [], []>} : vector<8x8xbf16>, vector<8x8xbf16>, vector<8x8xf32> -> vector<8x8xf32>
    %57 = arith.addf %54, %56 : vector<8x8xf32>
    %c0_35 = arith.constant 0 : index
    %c16_36 = arith.constant 16 : index
    %58 = vector.load %arg11[%c0_35, %c16_36] : memref<8x32xf32, #tpu.memory_space<vmem>>, vector<8x8xf32>
    tpu.vector_store %arg11[%c0_35, %c16_36], %57 {strides = array<i32>} : memref<8x32xf32, #tpu.memory_space<vmem>>, vector<8x8xf32>,
    %59 = vector.extract_strided_slice %4 {offsets = [0, 24], sizes = [8, 8], strides = [1, 1]} : vector<8x32xbf16> to vector<8x8xbf16>
    %60 = vector.extract_strided_slice %6 {offsets = [0, 24], sizes = [8, 8], strides = [1, 1]} : vector<8x32xbf16> to vector<8x8xbf16>
    %61 = vector.extract_strided_slice %8 {offsets = [0, 24], sizes = [8, 8], strides = [1, 1]} : vector<8x32xbf16> to vector<8x8xbf16>
    %cst_37 = arith.constant dense<0.000000e+00> : vector<8x8xf32>
    %62 = tpu.matmul %59, %60, %cst_37 {dimension_numbers = #tpu.dot_dimension_numbers<[1], [1], [0], [0], [0, 0, 1, 0], [], []>} : vector<8x8xbf16>, vector<8x8xbf16>, vector<8x8xf32> -> vector<8x8xf32>
    %63 = vector.extract_strided_slice %10 {offsets = [0, 3], sizes = [8, 1], strides = [1, 1]} : vector<8x4xf32> to vector<8x1xf32>
    %64 = vector.broadcast %63 : vector<8x1xf32> to vector<8x8xf32>
    %65 = arith.subf %62, %64 : vector<8x8xf32>
    %66 = math.exp %65 : vector<8x8xf32>
    %c0_38 = arith.constant 0 : index
    %c3 = arith.constant 3 : index
    %c0_39 = arith.constant 0 : index
    %c0_40 = arith.constant 0 : index
    %67 = vector.load %arg10[%c0_38, %c3, %c0_39, %c0_40] : memref<1x4x8x8xf32, #tpu.memory_space<vmem>>, vector<1x1x8x8xf32>
    %68 = vector.shape_cast %67 : vector<1x1x8x8xf32> to vector<8x8xf32>
    %69 = vector.shape_cast %66 : vector<8x8xf32> to vector<1x1x8x8xf32>
    tpu.vector_store %arg10[%c0_38, %c3, %c0_39, %c0_40], %69 {strides = array<i32>} : memref<1x4x8x8xf32, #tpu.memory_space<vmem>>, vector<1x1x8x8xf32>,
    %c0_41 = arith.constant 0 : index
    %c24 = arith.constant 24 : index
    %70 = vector.load %arg11[%c0_41, %c24] : memref<8x32xf32, #tpu.memory_space<vmem>>, vector<8x8xf32>
    %71 = arith.truncf %66 : vector<8x8xf32> to vector<8x8xbf16>
    %cst_42 = arith.constant dense<0.000000e+00> : vector<8x8xf32>
    %72 = tpu.matmul %71, %61, %cst_42 {dimension_numbers = #tpu.dot_dimension_numbers<[1], [0], [0], [1], [0, 0, 1, 1], [], []>} : vector<8x8xbf16>, vector<8x8xbf16>, vector<8x8xf32> -> vector<8x8xf32>
    %73 = arith.addf %70, %72 : vector<8x8xf32>
    %c0_43 = arith.constant 0 : index
    %c24_44 = arith.constant 24 : index
    %74 = vector.load %arg11[%c0_43, %c24_44] : memref<8x32xf32, #tpu.memory_space<vmem>>, vector<8x8xf32>
    tpu.vector_store %arg11[%c0_43, %c24_44], %73 {strides = array<i32>} : memref<8x32xf32, #tpu.memory_space<vmem>>, vector<8x8xf32>,
    %c0_i32_45 = arith.constant 0 : i32
    %75 = arith.cmpi eq, %arg2, %c0_i32_45 : i32
    %76 = arith.extui %75 : i1 to i32
    %c0_i32_46 = arith.constant 0 : i32
    %77 = arith.cmpi ne, %76, %c0_i32_46 : i32
    scf.if %77 {
      %c0_47 = arith.constant 0 : index
      %c0_48 = arith.constant 0 : index
      %78 = vector.load %arg11[%c0_47, %c0_48] : memref<8x32xf32, #tpu.memory_space<vmem>>, vector<8x32xf32>
      %79 = arith.truncf %78 : vector<8x32xf32> to vector<8x32xbf16>
      %c0_49 = arith.constant 0 : index
      %c0_50 = arith.constant 0 : index
      %80 = vector.load %arg7[%c0_49, %c0_50] : memref<32x32xbf16, #tpu.memory_space<vmem>>, vector<32x32xbf16>
      %cst_51 = arith.constant dense<0.000000e+00> : vector<8x32xf32>
      %81 = tpu.matmul %79, %80, %cst_51 {dimension_numbers = #tpu.dot_dimension_numbers<[1], [0], [0], [1], [0, 0, 1, 1], [], []>} : vector<8x32xbf16>, vector<32x32xbf16>, vector<8x32xf32> -> vector<8x32xf32>
      %c0_52 = arith.constant 0 : index
      %c0_53 = arith.constant 0 : index
      %82 = vector.load %arg8[%c0_52, %c0_53] : memref<1x32xf32, #tpu.memory_space<vmem>>, vector<1x32xf32>
      %83 = vector.broadcast %82 : vector<1x32xf32> to vector<8x32xf32>
      %84 = arith.addf %81, %83 : vector<8x32xf32>
      %c0_54 = arith.constant 0 : index
      %c0_55 = arith.constant 0 : index
      %c0_56 = arith.constant 0 : index
      %85 = vector.load %arg9[%c0_54, %c0_55, %c0_56] : memref<1x8x32xf32, #tpu.memory_space<vmem>>, vector<1x8x32xf32>
      %86 = vector.shape_cast %85 : vector<1x8x32xf32> to vector<8x32xf32>
      %87 = vector.shape_cast %84 : vector<8x32xf32> to vector<1x8x32xf32>
      tpu.vector_store %arg9[%c0_54, %c0_55, %c0_56], %87 {strides = array<i32>} : memref<1x8x32xf32, #tpu.memory_space<vmem>>, vector<1x8x32xf32>,
    } else {
    }
    return
  }
  func.func @transform_0(%arg0: i32, %arg1: i32, %arg2: i32) -> (i32, i32, i32) {
    %c0_i32 = arith.constant 0 : i32
    %c0_i32_0 = arith.constant 0 : i32
    return %arg0, %arg1, %c0_i32 : i32, i32, i32
  }
  func.func @transform_1(%arg0: i32, %arg1: i32, %arg2: i32) -> (i32, i32, i32) {
    %c0_i32 = arith.constant 0 : i32
    %c0_i32_0 = arith.constant 0 : i32
    return %arg0, %arg2, %c0_i32 : i32, i32, i32
  }
  func.func @transform_2(%arg0: i32, %arg1: i32, %arg2: i32) -> (i32, i32, i32) {
    %c0_i32 = arith.constant 0 : i32
    %c0_i32_0 = arith.constant 0 : i32
    return %arg0, %arg2, %c0_i32 : i32, i32, i32
  }
  func.func @transform_3(%arg0: i32, %arg1: i32, %arg2: i32) -> (i32, i32, i32) {
    %c0_i32 = arith.constant 0 : i32
    %c0_i32_0 = arith.constant 0 : i32
    return %arg0, %arg1, %c0_i32 : i32, i32, i32
  }
  func.func @transform_4(%arg0: i32, %arg1: i32, %arg2: i32) -> (i32, i32) {
    %c0_i32 = arith.constant 0 : i32
    %c0_i32_0 = arith.constant 0 : i32
    %c0_i32_1 = arith.constant 0 : i32
    return %c0_i32, %c0_i32_0 : i32, i32
  }
  func.func @transform_5(%arg0: i32, %arg1: i32, %arg2: i32) -> (i32, i32) {
    %c0_i32 = arith.constant 0 : i32
    %c0_i32_0 = arith.constant 0 : i32
    %c0_i32_1 = arith.constant 0 : i32
    return %c0_i32, %c0_i32_0 : i32, i32
  }
  func.func @transform_6(%arg0: i32, %arg1: i32, %arg2: i32) -> (i32, i32, i32) {
    %c0_i32 = arith.constant 0 : i32
    %c0_i32_0 = arith.constant 0 : i32
    return %arg0, %arg1, %c0_i32 : i32, i32, i32
  }
  func.func @transform_7(%arg0: i32, %arg1: i32, %arg2: i32) -> (i32, i32, i32, i32) {
    %c0_i32 = arith.constant 0 : i32
    %c0_i32_0 = arith.constant 0 : i32
    return %arg0, %c0_i32, %arg1, %arg2 : i32, i32, i32, i32
  }
}

</mosaic_0001>

<bundles_post_ra>
// kernel: multi_head_attention.5
= control target key start
LH: loop header
LB: loop body
LE: loop exit
PB: predicated region body
PF: predicated region fallthrough
CT: control target
= control target key end

     0   :  { %8 = vsyncpa [#allocation4], 0  ;;  %s276_s0 = inlined_call_operand.hbm [shape: f32[16,32], index: 0, kind: input, shape index: {}]   ;;  %s277_s1 = inlined_call_operand.hbm [shape: bf16[32,32], index: 1, kind: input, shape index: {}]   ;;  %s278_s2 = inlined_call_operand.hbm [shape: f32[1,32], index: 2, kind: input, shape index: {}]   ;;  %s279_s3 = inlined_call_operand.vmem [shape: bf16[16,32], index: 3, kind: output, shape index: {}]  }
   0x1   :  { %9 = vsyncpa [#allocation6], 0  ;;  %s27_s14 = sshll.u32 %s277_s1, 4  ;;  %s228_s15 = smov [#allocation5]   ;;  %s28_s14 = int_to_ptr.hbm [resolvable:$true] %s27_s14 }
   0x2   :  { %s29_s16 = sshll.u32 %s228_s15, 4  ;;  %s14_s19 = sshll.u32 %s276_s0, 4  ;;  %s30_s16 = int_to_ptr.vmem [resolvable:$true] %s29_s16  ;;  %s15_s19 = int_to_ptr.hbm [resolvable:$true] %s14_s19 }
   0x3   :  { %s229_s20 = smov 64   ;;  %s230_s21 = smov 4  }
   0x4   :  { %35 = dma.hbm_to_vmem [thread:$0]  %s28_s14, 256, %s30_s16, [#allocation6], %s229_s20, %s229_s20, %s230_s21  }
   0x5   :  { %s231_s22 = smov [#allocation3]   ;;  %s232_s24 = smov 128  }
   0x6   :  { %s16_s23 = sshll.u32 %s231_s22, 4  ;;  %s233_s25 = smov 8   ;;  %s17_s23 = int_to_ptr.vmem [resolvable:$true] %s16_s23 }
   0x7   :  { %22 = dma.hbm_to_vmem [thread:$0]  %s15_s19, 256, %s17_s23, [#allocation4], %s232_s24, %s232_s24, %s233_s25  }
   0x8   :  { %s41_s27 = sshll.u32 %s278_s2, 4  ;;  %s234_s28 = smov [#allocation7]   ;;  %s42_s27 = int_to_ptr.hbm [resolvable:$true] %s41_s27 }
   0x9   :  { %s43_s29 = sshll.u32 %s234_s28, 4  ;;  %s44_s29 = int_to_ptr.vmem [resolvable:$true] %s43_s29 }
   0xa   :  { %46 = dma.hbm_to_vmem [thread:$0]  %s42_s27, 16, %s44_s29, [#allocation6]  }
   0xb   :  { %224 = dma.done.wait [#allocation4], 256  }
   0xc   :  { %225 = vsyncadd [#allocation4], 4294967040 }
   0xd   :  { %226 = dma.done.wait [#allocation6], 272  }
   0xe   :  { %227 = vsyncadd [#allocation6], 4294967024  ;;  %vm64_vm0 = vcmask 261120   ;;  %v235_v0 = vmov 0.0   ;;  %v142_v1 = vld [vmem:[#allocation5 + $0x8] sm:$0xff]  ;;  %v141_v2 = vld [vmem:[#allocation5] sm:$0xff] }
   0xf   :  { %65 = vst.msk [vmem:[#allocation2] sm:$0xff] %vm64_vm0, %v235_v0  ;;  %98 = vmatpush.bf16.msra.mxu0 %v142_v1  ;;  %v69_v3 = vld [vmem:[#allocation3] sm:$0xff]  ;;  %v70_v4 = vld [vmem:[#allocation3 + $0x8] sm:$0xff]  ;;  %vm123_vm1 = vcmask 257024  }
  0x10   :  { %66 = vst.msk [vmem:[#allocation2 + $0x8] sm:$0xff] %vm64_vm0, %v235_v0  ;;  %v71_v5 = vpack.c.bf16 %v70_v4, %v69_v3  ;;  %v151_v10 = vld [vmem:[#allocation7] ss:$0 sm:$0xff] }
  0x13   :  { %99 = vmatpush.bf16.msra.mxu0 %v141_v2 }
  0x16   :  { %140 = vmatmul.msk.bf16.vlgmr.msra.gmra.mxu0 %vm64_vm0, %v71_v5  ;;  %v67_v6 = vld [vmem:[#allocation2] sm:$0xff] }
  0x17   :  { %v68_v9 = vld [vmem:[#allocation2 + $0x8] sm:$0xff] }
  0x93   :  { %v101_v7 = vpop.f32.mrf.mxu0 }
  0x94   :  { %v106_v8 = vadd.f32 %v101_v7, %v67_v6 }
  0x96   :  { %108 = vst.msk [vmem:[#allocation2] sm:$0xff] %vm64_vm0, %v106_v8 }
  0x9b   :  { %v103_v11 = vpop.f32.mrf.mxu0 }
  0x9c   :  { %v107_v12 = vadd.f32 %v103_v11, %v68_v9 }
  0x9d   :  { %v113_v13 = vld [vmem:[#allocation2] sm:$0xff] }
  0x9e   :  { %v119_v14 = vadd.f32 %v151_v10, %v113_v13  ;;  %109 = vst.msk [vmem:[#allocation2 + $0x8] sm:$0xff] %vm64_vm0, %v107_v12 }
  0xa0   :  { %v121_v15 = vpack.c.bf16 %v119_v14, %v119_v14 }
  0xa2   :  { %124 = vst.msk [vmem:[%s279_s3] sm:$0xf] %vm123_vm1, %v121_v15 }
  0xa5   :  { %v114_v16 = vld [vmem:[#allocation2 + $0x8] sm:$0xff] }
  0xa6   :  { %v120_v17 = vadd.f32 %v151_v10, %v114_v16 }
  0xa8   :  { %v122_v18 = vpack.c.bf16 %v120_v17, %v120_v17 }
  0xaa   :  { %125 = vst.msk [vmem:[%s279_s3 + $0x4] sm:$0xf] %vm123_vm1, %v122_v18 }
  0xab   :  { %130 = vsyncpa [#allocation4], 1 }
  0xac   :  { %131 = vsyncpa [#allocation6], 1 }

// kernel: multi_head_attention.6
= control target key start
LH: loop header
LB: loop body
LE: loop exit
PB: predicated region body
PF: predicated region fallthrough
CT: control target
= control target key end

     0   :  { %8 = vsyncpa [#allocation4], 0  ;;  %s237_s0 = inlined_call_operand.hbm [shape: f32[16,32], index: 0, kind: input, shape index: {}]   ;;  %s238_s1 = inlined_call_operand.hbm [shape: bf16[32,32], index: 1, kind: input, shape index: {}]   ;;  %s239_s2 = inlined_call_operand.vmem [shape: f32[1,32], index: 2, kind: input, shape index: {}]   ;;  %s240_s3 = inlined_call_operand.vmem [shape: bf16[16,32], index: 3, kind: output, shape index: {}]  }
   0x1   :  { %s14_s14 = sshll.u32 %s237_s0, 4  ;;  %s15_s14 = int_to_ptr.hbm [resolvable:$true] %s14_s14 }
   0x2   :  { %9 = vsyncpa [#allocation6], 0  ;;  %s190_s15 = smov [#allocation3]   ;;  %s27_s19 = sshll.u32 %s238_s1, 4  ;;  %s28_s19 = int_to_ptr.hbm [resolvable:$true] %s27_s19 }
   0x3   :  { %s16_s16 = sshll.u32 %s190_s15, 4  ;;  %s191_s20 = smov 128   ;;  %s17_s16 = int_to_ptr.vmem [resolvable:$true] %s16_s16 }
   0x4   :  { %s192_s21 = smov 8   ;;  %s193_s22 = smov [#allocation5]  }
   0x5   :  { %22 = dma.hbm_to_vmem [thread:$0]  %s15_s14, 256, %s17_s16, [#allocation4], %s191_s20, %s191_s20, %s192_s21  }
   0x6   :  { %s29_s23 = sshll.u32 %s193_s22, 4  ;;  %s194_s24 = smov 64   ;;  %s30_s23 = int_to_ptr.vmem [resolvable:$true] %s29_s23 }
   0x7   :  { %s195_s25 = smov 4  }
   0x8   :  { %35 = dma.hbm_to_vmem [thread:$0]  %s28_s19, 256, %s30_s23, [#allocation6], %s194_s24, %s194_s24, %s195_s25  }
   0x9   :  { %186 = dma.done.wait [#allocation4], 256  }
   0xa   :  { %187 = vsyncadd [#allocation4], 4294967040 }
   0xb   :  { %188 = dma.done.wait [#allocation6], 256  }
   0xc   :  { %189 = vsyncadd [#allocation6], 4294967040  ;;  %vm51_vm0 = vcmask 261120   ;;  %v196_v0 = vmov 0.0   ;;  %v129_v1 = vld [vmem:[#allocation5 + $0x8] sm:$0xff]  ;;  %v128_v2 = vld [vmem:[#allocation5] sm:$0xff] }
   0xd   :  { %52 = vst.msk [vmem:[#allocation2] sm:$0xff] %vm51_vm0, %v196_v0  ;;  %85 = vmatpush.bf16.msra.mxu0 %v129_v1  ;;  %v56_v3 = vld [vmem:[#allocation3] sm:$0xff]  ;;  %v57_v4 = vld [vmem:[#allocation3 + $0x8] sm:$0xff]  ;;  %v137_v10 = vld [vmem:[%s239_s2] ss:$0 sm:$0xff]  ;;  %vm110_vm1 = vcmask 257024  }
   0xe   :  { %53 = vst.msk [vmem:[#allocation2 + $0x8] sm:$0xff] %vm51_vm0, %v196_v0  ;;  %v58_v5 = vpack.c.bf16 %v57_v4, %v56_v3 }
  0x11   :  { %86 = vmatpush.bf16.msra.mxu0 %v128_v2 }
  0x14   :  { %127 = vmatmul.msk.bf16.vlgmr.msra.gmra.mxu0 %vm51_vm0, %v58_v5  ;;  %v54_v6 = vld [vmem:[#allocation2] sm:$0xff] }
  0x15   :  { %v55_v9 = vld [vmem:[#allocation2 + $0x8] sm:$0xff] }
  0x91   :  { %v88_v7 = vpop.f32.mrf.mxu0 }
  0x92   :  { %v93_v8 = vadd.f32 %v88_v7, %v54_v6 }
  0x94   :  { %95 = vst.msk [vmem:[#allocation2] sm:$0xff] %vm51_vm0, %v93_v8 }
  0x99   :  { %v90_v11 = vpop.f32.mrf.mxu0 }
  0x9a   :  { %v94_v12 = vadd.f32 %v90_v11, %v55_v9 }
  0x9b   :  { %v100_v13 = vld [vmem:[#allocation2] sm:$0xff] }
  0x9c   :  { %v106_v14 = vadd.f32 %v137_v10, %v100_v13  ;;  %96 = vst.msk [vmem:[#allocation2 + $0x8] sm:$0xff] %vm51_vm0, %v94_v12 }
  0x9e   :  { %v108_v15 = vpack.c.bf16 %v106_v14, %v106_v14 }
  0xa0   :  { %111 = vst.msk [vmem:[%s240_s3] sm:$0xf] %vm110_vm1, %v108_v15 }
  0xa3   :  { %v101_v16 = vld [vmem:[#allocation2 + $0x8] sm:$0xff] }
  0xa4   :  { %v107_v17 = vadd.f32 %v137_v10, %v101_v16 }
  0xa6   :  { %v109_v18 = vpack.c.bf16 %v107_v17, %v107_v17 }
  0xa8   :  { %112 = vst.msk [vmem:[%s240_s3 + $0x4] sm:$0xf] %vm110_vm1, %v109_v18 }
  0xa9   :  { %117 = vsyncpa [#allocation4], 1 }
  0xaa   :  { %118 = vsyncpa [#allocation6], 1 }

// kernel: multi_head_attention.7
= control target key start
LH: loop header
LB: loop body
LE: loop exit
PB: predicated region body
PF: predicated region fallthrough
CT: control target
= control target key end

     0   :  { %8 = vsyncpa [#allocation4], 0  ;;  %s144_s15 = smov [#allocation3]   ;;  %s145_s17 = smov 128   ;;  %s191_s0 = inlined_call_operand.hbm [shape: f32[16,32], index: 0, kind: input, shape index: {}]   ;;  %s192_s1 = inlined_call_operand.vmem [shape: bf16[32,32], index: 1, kind: input, shape index: {}]   ;;  %s193_s2 = inlined_call_operand.vmem [shape: f32[1,32], index: 2, kind: input, shape index: {}]   ;;  %s194_s3 = inlined_call_operand.vmem [shape: bf16[16,32], index: 3, kind: output, shape index: {}]  }
   0x1   :  { %s13_s14 = sshll.u32 %s191_s0, 4  ;;  %s15_s16 = sshll.u32 %s144_s15, 4  ;;  %s14_s14 = int_to_ptr.hbm [resolvable:$true] %s13_s14  ;;  %s16_s16 = int_to_ptr.vmem [resolvable:$true] %s15_s16 }
   0x2   :  { %s146_s18 = smov 8  }
   0x3   :  { %21 = dma.hbm_to_vmem [thread:$0]  %s14_s14, 256, %s16_s16, [#allocation4], %s145_s17, %s145_s17, %s146_s18  }
   0x4   :  { %142 = dma.done.wait [#allocation4], 256  }
   0x5   :  { %143 = vsyncadd [#allocation4], 4294967040  ;;  %vm35_vm0 = vcmask 261120   ;;  %v147_v0 = vmov 0.0   ;;  %v112_v1 = vld [vmem:[%s192_s1 + $0x8] sm:$0xff]  ;;  %v111_v2 = vld [vmem:[%s192_s1] sm:$0xff] }
   0x6   :  { %36 = vst.msk [vmem:[#allocation2] sm:$0xff] %vm35_vm0, %v147_v0  ;;  %69 = vmatpush.bf16.msra.mxu0 %v112_v1  ;;  %v40_v3 = vld [vmem:[#allocation3] sm:$0xff]  ;;  %v41_v4 = vld [vmem:[#allocation3 + $0x8] sm:$0xff]  ;;  %v117_v10 = vld [vmem:[%s193_s2] ss:$0 sm:$0xff]  ;;  %vm94_vm1 = vcmask 257024  }
   0x7   :  { %37 = vst.msk [vmem:[#allocation2 + $0x8] sm:$0xff] %vm35_vm0, %v147_v0  ;;  %v42_v5 = vpack.c.bf16 %v41_v4, %v40_v3 }
   0xa   :  { %70 = vmatpush.bf16.msra.mxu0 %v111_v2 }
   0xd   :  { %110 = vmatmul.msk.bf16.vlgmr.msra.gmra.mxu0 %vm35_vm0, %v42_v5  ;;  %v38_v6 = vld [vmem:[#allocation2] sm:$0xff] }
   0xe   :  { %v39_v9 = vld [vmem:[#allocation2 + $0x8] sm:$0xff] }
  0x8a   :  { %v72_v7 = vpop.f32.mrf.mxu0 }
  0x8b   :  { %v77_v8 = vadd.f32 %v72_v7, %v38_v6 }
  0x8d   :  { %79 = vst.msk [vmem:[#allocation2] sm:$0xff] %vm35_vm0, %v77_v8 }
  0x92   :  { %v74_v11 = vpop.f32.mrf.mxu0 }
  0x93   :  { %v78_v12 = vadd.f32 %v74_v11, %v39_v9 }
  0x94   :  { %v84_v13 = vld [vmem:[#allocation2] sm:$0xff] }
  0x95   :  { %v90_v14 = vadd.f32 %v117_v10, %v84_v13  ;;  %80 = vst.msk [vmem:[#allocation2 + $0x8] sm:$0xff] %vm35_vm0, %v78_v12 }
  0x97   :  { %v92_v15 = vpack.c.bf16 %v90_v14, %v90_v14 }
  0x99   :  { %95 = vst.msk [vmem:[%s194_s3] sm:$0xf] %vm94_vm1, %v92_v15 }
  0x9c   :  { %v85_v16 = vld [vmem:[#allocation2 + $0x8] sm:$0xff] }
  0x9d   :  { %v91_v17 = vadd.f32 %v117_v10, %v85_v16 }
  0x9f   :  { %v93_v18 = vpack.c.bf16 %v91_v17, %v91_v17 }
  0xa1   :  { %96 = vst.msk [vmem:[%s194_s3 + $0x4] sm:$0xf] %vm94_vm1, %v93_v18 }
  0xa2   :  { %101 = vsyncpa [#allocation4], 1 }

// kernel: multi_head_attention.8
= control target key start
LH: loop header
LB: loop body
LE: loop exit
PB: predicated region body
PF: predicated region fallthrough
CT: control target
= control target key end

     0   :  { %s630_s9 = smov 0   ;;  %s632_s10 = smov 0   ;;  %s701_s0 = inlined_call_operand.vmem [shape: bf16[2,8,32], index: 0, kind: input, shape index: {}]   ;;  %s702_s1 = inlined_call_operand.vmem [shape: bf16[2,8,32], index: 1, kind: input, shape index: {}]   ;;  %s703_s2 = inlined_call_operand.vmem [shape: f32[2,8,4], index: 2, kind: output, shape index: {}]  }
   0x1   :  { %s634_s11 = smov 0  }
   0x2 LB: > { %s31_s12 = sadd.s32 1, %s600_s10  ;;  %p516_p0 = scmp.ge.s32.totalorder %s604_s11, 1  ;;  %s604_s11 = sphi %s634_s11, %s12_s11   ;;  %s600_s10 = sphi %s632_s10, %s705_s10   ;;  %s596_s9 = sphi %s630_s9, %s704_s9  }
   0x3   : > { %p33_p1 = scmp.ge.s32.totalorder %s31_s12, 2  ;;  %p151_p2 = scmp.lt.s32.totalorder %s604_s11, 3 }
   0x5   : > { %s707_s12 = smov (%p33_p1, %s31_s12), 0  ;;  %p152_p3 = pnand %p516_p0, %p151_p2 }
   0x6   : > { %p184_p4 = scmp.lt.s32.totalorder (!%p152_p3), %s596_s9, 1  ;;  %s606_s20 = smov (!%p152_p3), 120  }
   0x7   : > { %155 = sbr.rel (%p152_p3) target bundleno = 682 (0x2aa), region = 28  ;;  %s607_s21 = smov (!%p152_p3), 104  }
   0x8   : > { %s608_s22 = smov (!%p152_p3), 112  }
   0xc   : > { %s709_s9 = smov (!%p184_p4, %s596_s9), 1  ;;  %vm215_vm0 = vcmask 64512   ;;  %vm210_vm1 = vcmask 31744   ;;  %v609_v10 = vmov -inf   ;;  %v610_v20 = vmov 0  }
   0xd   : > { %s517_s13 = sshll.u32 %s709_s9, 2  ;;  %211 = vst.msk [vmem:[#allocation2] sm:$0xff] %vm210_vm1, %v609_v10  ;;  %559 = vset.pattern.permute.xlu0 %v610_v20  ;;  %v611_v21 = vmov 0.0   ;;  %vm257_vm2 = vcmask 7168   ;;  %v612_v35 = vmov 1   ;;  %v613_v36 = vmov 3  }
   0xe   : > { %s197_s16 = scalar_lea.vmem %s702_s1, %s517_s13  ;;  %s190_s19 = scalar_lea.vmem %s701_s0, %s517_s13  ;;  %212 = vst.msk [vmem:[#allocation3] sm:$0xff] %vm210_vm1, %v611_v21  ;;  %560 = vset.pattern.permute.xlu1 %v612_v35  ;;  %vm311_vm3 = vcmask 15368   ;;  %v614_v43 = vmov 2   ;;  %vm359_vm4 = vcmask 23568   ;;  %vm407_vm5 = vcmask 31768  }
   0xf   : > { %v214_v0 = vld [vmem:[%s197_s16] sm:$0xf]  ;;  %561 = vset.pattern.permute.xlu2 %v614_v43  ;;  %s519_s23 = sshll.u32 %s709_s9, 3 }
  0x10   : > { %v220_v1 = vsel %vm215_vm0, %v214_v0, 0  ;;  %v266_v2 = vunpack.c.l.b16 %v214_v0  ;;  %v213_v3 = vld [vmem:[%s190_s19] sm:$0xf]  ;;  %s204_s26 = scalar_lea.vmem %s703_s2, %s519_s23 }
  0x11   : > { %229 = vmatpush.bf16.xpose.msra.mxu0 %v220_v1  ;;  %v261_v4 = vunpack.c.l.b16 %v213_v3 }
  0x12   : > { %v267_v5 = vpack.c.b16 %v266_v2, %v266_v2 }
  0x13   : > { %v262_v6 = vpack.c.b16 %v261_v4, %v261_v4 }
  0x14   : > { %268 = vrot.lane.b32.xlu0 %v267_v5, %s606_s20  ;;  %364 = vrot.lane.b32.xlu2 %v267_v5, %s607_s21  ;;  %v235_v23 = vld [vmem:[#allocation2] sm:$0xff] }
  0x15   : > { %263 = vrot.lane.b32.xlu1 %v262_v6, %s606_s20  ;;  %v240_v60 = vld [vmem:[#allocation3] sm:$0xff] }
  0x18   : > { %520 = vmatmul.msk.bf16.vlgmr.msra.gmra.mxu0 %vm215_vm0, %v213_v3 }
  0x1c   : > { %316 = vrot.lane.b32.xlu0 %v267_v5, %s608_s22  ;;  %362 = vrot.lane.b32.xlu2 %v262_v6, %s607_s21 }
  0x1d   : > { %314 = vrot.lane.b32.xlu1 %v262_v6, %s608_s22 }
  0x6e   : > { %v365_v7 = vpop.permute.xlu2 %364 }
  0x6f   : > { %v370_v8 = vsel %vm215_vm0, %v365_v7, 0 }
  0x70   : > { %379 = vmatpush.bf16.xpose.msra.mxu3 %v370_v8 }
  0x76   : > { %v363_v9 = vpop.permute.xlu2 %362 }
  0x77   : > { %523 = vmatmul.msk.bf16.vlgmr.msra.gmra.mxu3 %vm215_vm0, %v363_v9 }
  0x86   : > { %v269_v11 = vpop.permute.xlu0 %268 }
  0x87   : > { %v274_v12 = vsel %vm215_vm0, %v269_v11, 0  ;;  %v264_v13 = vpop.permute.xlu1 %263 }
  0x88   : > { %283 = vmatpush.bf16.xpose.msra.mxu1 %v274_v12 }
  0x8e   : > { %v317_v14 = vpop.permute.xlu0 %316 }
  0x8f   : > { %521 = vmatmul.msk.bf16.vlgmr.msra.gmra.mxu1 %vm215_vm0, %v264_v13  ;;  %v322_v15 = vsel %vm215_vm0, %v317_v14, 0  ;;  %v315_v16 = vpop.permute.xlu1 %314 }
  0x90   : > { %331 = vmatpush.bf16.xpose.msra.mxu2 %v322_v15 }
  0x95   : > { %v231_v17 = vpop.f32.mrf.mxu0 }
  0x96   : > { %v236_v18 = vsel %vm215_vm0, %v231_v17, -inf }
  0x97   : > { %522 = vmatmul.msk.bf16.vlgmr.msra.gmra.mxu2 %vm215_vm0, %v315_v16  ;;  %237 = vmax.xlane.f32.xlu0 %v236_v18 }
  0x9d   : > { %v233_v19 = vpop.f32.mrf.mxu0 }
  0xfa   : > { %v668_v22 = vpop.f32.mrf.mxu3 }
  0xfb   : > { %v386_v33 = vsel %vm215_vm0, %v668_v22, -inf }
 0x102   : > { %v383_v24 = vpop.f32.mrf.mxu3 }
 0x10a   : > { %v238_v25 = vpop.xlane.xlu0 %237 }
 0x10b   : > { %v239_v26 = vmax.f32 %v235_v23, %v238_v25 }
 0x10c   : > { %v285_v27 = vpop.f32.mrf.mxu1 }
 0x10d   : > { %v241_v28 = vsub.f32 %v235_v23, %v239_v26  ;;  %258 = vst.msk [vmem:[#allocation2] sm:$0xff] %vm257_vm2, %v239_v26  ;;  %247 = vperm.xlu0 %559, %v239_v26   ;;  %v290_v29 = vsel %vm215_vm0, %v285_v27, -inf }
 0x10e   : > { %291 = vmax.xlane.f32.xlu1 %v290_v29 }
 0x10f   : > { %v242_v55 = vmul.f32 1.442695, %v241_v28 }
 0x114   : > { %v287_v30 = vpop.f32.mrf.mxu1  ;;  %v289_v40 = vld [vmem:[#allocation2] sm:$0xff] }
 0x115   : > { %563 = vset.pattern.permute.xlu0 %v613_v36 }
 0x11a   : > { %v333_v31 = vpop.f32.mrf.mxu2 }
 0x11b   : > { %v338_v32 = vsel %vm215_vm0, %v333_v31, -inf }
 0x11c   : > { %339 = vmax.xlane.f32.xlu2 %v338_v32 }
 0x122   : > { %v335_v34 = vpop.f32.mrf.mxu2 }
 0x124   : > { %387 = vmax.xlane.f32.xlu2 %v386_v33 }
 0x17f   : > { %v248_v37 = vpop.permute.xlu0 %247 }
 0x180   : > { %v250_v38 = vsub.f32 %v231_v17, %v248_v37 }
 0x181   : > { %v292_v39 = vpop.xlane.xlu1 %291 }
 0x182   : > { %v251_v41 = vmul.f32 1.442695, %v250_v38  ;;  %v293_v42 = vmax.f32 %v289_v40, %v292_v39 }
 0x184   : > { %564 = vpow2.f32 %v251_v41  ;;  %v295_v44 = vsub.f32 %v289_v40, %v293_v42  ;;  %312 = vst.msk [vmem:[#allocation2] sm:$0xff] %vm311_vm3, %v293_v42  ;;  %301 = vperm.xlu1 %560, %v293_v42  }
 0x185   : > { %566 = vpow2.f32 %v242_v55 }
 0x186   : > { %v296_v12 = vmul.f32 1.442695, %v295_v44 }
 0x18a   : > { %v565_v45 = vpop.eup %564 }
 0x18b   : > { %v253_v46 = vsel %vm215_vm0, %v565_v45, 0.0  ;;  %v337_v48 = vld [vmem:[#allocation2] sm:$0xff]  ;;  %v567_v59 = vpop.eup %566 }
 0x18c   : > { %254 = vadd.xlane.f32.xlu2 %v253_v46  ;;  %562 = vset.pattern.permute.xlu1 %v613_v36  ;;  %v244_v61 = vmul.f32 %v567_v59, %v240_v60 }
 0x18f   : > { %v340_v47 = vpop.xlane.xlu2 %339 }
 0x190   : > { %v341_v49 = vmax.f32 %v337_v48, %v340_v47 }
 0x192   : > { %v343_v50 = vsub.f32 %v337_v48, %v341_v49  ;;  %360 = vst.msk [vmem:[#allocation2] sm:$0xff] %vm359_vm4, %v341_v49 }
 0x194   : > { %v344_v18 = vmul.f32 1.442695, %v343_v50 }
 0x197   : > { %v388_v51 = vpop.xlane.xlu2 %387 }
 0x199   : > { %v385_v52 = vld [vmem:[#allocation2] sm:$0xff] }
 0x19a   : > { %v389_v53 = vmax.f32 %v385_v52, %v388_v51 }
 0x19c   : > { %v391_v54 = vsub.f32 %v385_v52, %v389_v53  ;;  %408 = vst.msk [vmem:[#allocation2] sm:$0xff] %vm407_vm5, %v389_v53  ;;  %397 = vperm.xlu1 %562, %v389_v53  }
 0x1a3   : > { %v413_v33 = vld [vmem:[#allocation2] sm:$0xff] }
 0x1a4   : > { %349 = vperm.xlu2 %561, %v341_v49  }
 0x1f6   : > { %v302_v56 = vpop.permute.xlu1 %301 }
 0x1f7   : > { %v304_v57 = vsub.f32 %v285_v27, %v302_v56 }
 0x1f9   : > { %v305_v58 = vmul.f32 1.442695, %v304_v57 }
 0x1fb   : > { %568 = vpow2.f32 %v305_v58 }
 0x1ff   : > { %v255_v62 = vpop.xlane.xlu2 %254 }
 0x200   : > { %v256_v63 = vadd.f32 %v255_v62, %v244_v61 }
 0x201   : > { %v569_v0 = vpop.eup %568 }
 0x202   : > { %259 = vst.msk [vmem:[#allocation3] sm:$0xff] %vm257_vm2, %v256_v63  ;;  %v307_v1 = vsel %vm215_vm0, %v569_v0, 0.0 }
 0x203   : > { %308 = vadd.xlane.f32.xlu1 %v307_v1 }
 0x207   : > { %v350_v2 = vpop.permute.xlu2 %349 }
 0x208   : > { %v352_v3 = vsub.f32 %v333_v31, %v350_v2 }
 0x209   : > { %v294_v13 = vld [vmem:[#allocation3] sm:$0xff] }
 0x20a   : > { %v353_v4 = vmul.f32 1.442695, %v352_v3 }
 0x20c   : > { %570 = vpow2.f32 %v353_v4 }
 0x20e   : > { %v398_v5 = vpop.permute.xlu1 %397 }
 0x20f   : > { %v400_v6 = vsub.f32 %v668_v22, %v398_v5  ;;  %v392_v22 = vmul.f32 1.442695, %v391_v54 }
 0x211   : > { %v401_v7 = vmul.f32 1.442695, %v400_v6 }
 0x212   : > { %v571_v8 = vpop.eup %570 }
 0x213   : > { %572 = vpow2.f32 %v401_v7  ;;  %v355_v9 = vsel %vm215_vm0, %v571_v8, 0.0 }
 0x214   : > { %356 = vadd.xlane.f32.xlu2 %v355_v9  ;;  %574 = vpow2.f32 %v296_v12 }
 0x215   : > { %576 = vpow2.f32 %v344_v18 }
 0x216   : > { %578 = vpow2.f32 %v392_v22 }
 0x219   : > { %v573_v10 = vpop.eup %572 }
 0x21a   : > { %v403_v11 = vsel %vm215_vm0, %v573_v10, 0.0  ;;  %v575_v14 = vpop.eup %574 }
 0x21b   : > { %404 = vadd.xlane.f32.xlu0 %v403_v11  ;;  %v298_v15 = vmul.f32 %v575_v14, %v294_v13  ;;  %v577_v20 = vpop.eup %576 }
 0x21c   : > { %v579_v25 = vpop.eup %578 }
 0x276   : > { %v309_v16 = vpop.xlane.xlu1 %308 }
 0x277   : > { %v310_v17 = vadd.f32 %v309_v16, %v298_v15 }
 0x279   : > { %313 = vst.msk [vmem:[#allocation3] sm:$0xff] %vm311_vm3, %v310_v17 }
 0x280   : > { %v342_v19 = vld [vmem:[#allocation3] sm:$0xff] }
 0x281   : > { %v346_v21 = vmul.f32 %v577_v20, %v342_v19 }
 0x287   : > { %v357_v23 = vpop.xlane.xlu2 %356 }
 0x288   : > { %v358_v24 = vadd.f32 %v357_v23, %v346_v21 }
 0x28a   : > { %361 = vst.msk [vmem:[#allocation3] sm:$0xff] %vm359_vm4, %v358_v24 }
 0x28e   : > { %v405_v28 = vpop.xlane.xlu0 %404 }
 0x291   : > { %v390_v26 = vld [vmem:[#allocation3] sm:$0xff] }
 0x292   : > { %v394_v27 = vmul.f32 %v579_v25, %v390_v26 }
 0x294   : > { %v406_v29 = vadd.f32 %v405_v28, %v394_v27 }
 0x296   : > { %409 = vst.msk [vmem:[#allocation3] sm:$0xff] %vm407_vm5, %v406_v29 }
 0x29d   : > { %v414_v30 = vld [vmem:[#allocation3] sm:$0xff] }
 0x29e   : > { %580 = vlog2.f32 %v414_v30 }
 0x2a4   : > { %v581_v31 = vpop.eup %580 }
 0x2a5   : > { %v416_v32 = vmul.f32 0.6931472, %v581_v31 }
 0x2a7   : > { %v417_v34 = vadd.f32 %v416_v32, %v413_v33 }
 0x2a9   : > { %419 = vst.msk [vmem:[%s204_s26] sm:$0xff] %vm210_vm1, %v417_v34 }
 0x2aa PF: > { %s12_s11 = sadd.s32 1, %s604_s11   ;;  %s704_s9 = smov %s600_s10 }
 0x2ab   : > { %p9_p5 = scmp.ge.s32.totalorder %s12_s11, 4   ;;  %s705_s10 = smov %s707_s12 }
 0x2ad   :  { %11 = sbr.rel (!%p9_p5) target bundleno = 2 (0x2), region = 69 }

// kernel: multi_head_attention.9
= control target key start
LH: loop header
LB: loop body
LE: loop exit
PB: predicated region body
PF: predicated region fallthrough
CT: control target
= control target key end

     0   :  { %s1445_s0 = inlined_call_operand.vmem [shape: bf16[2,8,32], index: 0, kind: input, shape index: {}]   ;;  %s1446_s1 = inlined_call_operand.vmem [shape: bf16[2,8,32], index: 1, kind: input, shape index: {}]   ;;  %s1447_s2 = inlined_call_operand.vmem [shape: bf16[2,8,32], index: 2, kind: input, shape index: {}]   ;;  %s1448_s3 = inlined_call_operand.vmem [shape: f32[2,8,4], index: 3, kind: input, shape index: {}]   ;;  %s1449_s4 = inlined_call_operand.hbm [shape: bf16[32,32], index: 4, kind: input, shape index: {}]   ;;  %s1450_s5 = inlined_call_operand.vmem [shape: f32[1,32], index: 5, kind: input, shape index: {}]   ;;  %s1451_s6 = inlined_call_operand.hbm [shape: f32[2,8,32], index: 6, kind: output, shape index: {0}]   ;;  %s1452_s7 = inlined_call_operand.hbm [shape: f32[2,4,8,8], index: 7, kind: output, shape index: {1}]  }
   0x1   :  { %1454 = sst [smem:[#allocation12_spill]] %s1445_s0 }
   0x2   :  { %1455 = sst [smem:[#allocation13_spill]] %s1446_s1 }
   0x3   :  { %1456 = sst [smem:[#allocation14_spill]] %s1447_s2 }
   0x4   :  { %13 = vsyncpa [#allocation4], 0 }
   0x5   :  { %14 = vsyncpa [#allocation5], 0 }
   0x6   :  { %16 = vsyncpa [#allocation5 + $0x1], 0 }
   0x7   :  { %17 = vsyncpa [#allocation8], 0 }
   0x8   :  { %19 = vsyncpa [#allocation8 + $0x1], 0  ;;  %s1274_s24 = smov 0   ;;  %s1276_s25 = smov 0  }
   0x9   :  { %s1278_s26 = smov 0   ;;  %s1280_s27 = smov 0  }
   0xa   :  { %s1282_s28 = smov 0   ;;  %s1284_s29 = smov 0  }
   0xb LB: > { %s932_s30 = sadd.s32 4294967295, %s1217_s29   ;;  %s933_s8 = sadd.s32 4294967294, %s1217_s29   ;;  %s1217_s29 = sphi %s1284_s29, %s25_s29   ;;  %s1213_s28 = sphi %s1282_s28, %s1467_s28   ;;  %s1209_s27 = sphi %s1280_s27, %s1466_s27   ;;  %s1205_s26 = sphi %s1278_s26, %s1465_s26   ;;  %s1201_s25 = sphi %s1276_s25, %s1464_s25   ;;  %s1197_s24 = sphi %s1274_s24, %s1463_s24  }
   0xc   : > { %s44_s9 = sadd.s32 1, %s1213_s28  ;;  %s207_s10 = sadd.s32 1, %s1205_s26 }
   0xd   : > { %p46_p0 = scmp.ge.s32.totalorder %s44_s9, 2  ;;  %p217_p1 = scmp.ne.s32.totalorder %s1205_s26, %s1201_s25 }
   0xe   : > { %p218_p2 = scmp.eq.s32.totalorder %s932_s30, 1  ;;  %p223_p3 = scmp.ne.s32.totalorder %s1201_s25, %s1197_s24 }
   0xf   : > { %s1469_s9 = smov (%p46_p0, %s44_s9), 0  ;;  %p224_p5 = scmp.eq.s32.totalorder %s933_s8, 1 }
  0x10   : > { %p1314_p4 = por %p218_p2, %p217_p1  ;;  %s202_s12 = ssub.s32 %s1213_s28, %s1469_s9 }
  0x11   : > { %p934_p6 = scmp.ge.s32.totalorder %s1217_s29, 1  ;;  %p205_p7 = scmp.eq.s32.totalorder %s202_s12, 0 }
  0x12   : > { %p1321_p8 = por %p224_p5, %p223_p3  ;;  %p261_p9 = scmp.lt.s32.totalorder %s1217_s29, 3 }
  0x13   : > { %s1327_s14 = scalar_select %p205_p7, %s1205_s26, %s207_s10  }
  0x14   : > { %p262_p10 = pnand %p934_p6, %p261_p9  ;;  %p994_p11 = scmp.eq.s32.totalorder %s932_s30, 0 }
  0x15   : > { %s272_s17 = sshll.u32 %s1449_s4, 4  ;;  %s1219_s18 = smov [#allocation3]   ;;  %s273_s17 = int_to_ptr.hbm [resolvable:$true] %s272_s17 }
  0x16   : > { %p983_p12 = pneg %p262_p10  ;;  %s274_s19 = sshll.u32 %s1219_s18, 4  ;;  %s275_s19 = int_to_ptr.vmem [resolvable:$true] %s274_s19 }
  0x17   : > { %s1220_s20 = smov 64   ;;  %s1221_s21 = smov 4  }
  0x18   : > { %p984_p13 = pnand %p994_p11, %p983_p12  ;;  %333 = sbr.rel (%p262_p10) target bundleno = 743 (0x2e7), region = 44 }
  0x1a   : > { %986 = dma.hbm_to_vmem [thread:$0]  (!%p984_p13), %s273_s17, 256, %s275_s19, [#allocation4], %s1220_s20, %s1220_s20, %s1221_s21  }
  0x1d   : > { %1184 = dma.done.wait (%p994_p11), [#allocation4], 256  }
  0x1e   : > { %1186 = vsyncadd (%p994_p11), [#allocation4], 4294967040  ;;  %p394_p0 = scmp.lt.s32.totalorder %s1209_s27, 1  ;;  %v1222_v0 = vmov 0   ;;  %s1459_s1 = sld [smem:[#allocation13_spill]]  ;;  %vm433_vm0 = vcmask 64512  }
  0x1f   : > { %1060 = vset.pattern.permute.xlu0 %v1222_v0  ;;  %s1460_s0 = sld [smem:[#allocation12_spill]]  ;;  %s1223_s18 = smov 120   ;;  %vm467_vm1 = vcmask 1043456   ;;  %v1226_v21 = vmov 1   ;;  %v1227_v22 = vmov 2   ;;  %v1228_v26 = vmov 3  }
  0x20   : > { %s395_s22 = scalar_select %p394_p0, %s1209_s27, 1  ;;  %1061 = vset.pattern.permute.xlu2 %v1226_v21  ;;  %1062 = vset.pattern.permute.xlu1 %v1227_v22  ;;  %vm427_vm2 = vcmask 261120   ;;  %v1229_v33 = vmov 0.0   ;;  %vm555_vm3 = vcmask 130112   ;;  %vm617_vm4 = vcmask 195712  }
  0x21   : > { %s1224_s19 = smov 112   ;;  %s1225_s8 = smov 104   ;;  %428 = vst.msk [vmem:[#allocation2] sm:$0xff] %vm427_vm2, %v1229_v33  ;;  %vm679_vm5 = vcmask 261312  }
  0x22   : > { %s941_s23 = sshll.u32 %s395_s22, 2  ;;  %s944_s17 = sshll.u32 %s395_s22, 3 }
  0x23   : > { %s421_s30 = scalar_lea.vmem %s1448_s3, %s944_s17  ;;  %s1461_s2 = sld [smem:[#allocation14_spill]] }
  0x24   : > { %s407_s10 = scalar_lea.vmem %s1459_s1, %s941_s23  ;;  %v432_v8 = vld [vmem:[%s421_s30] sm:$0xff]  ;;  %s1453_s17 = smov 8  }
  0x25   : > { %s400_s16 = scalar_lea.vmem %s1460_s0, %s941_s23  ;;  %v430_v1 = vld [vmem:[%s407_s10] sm:$0xf]  ;;  %s974_s20 = sshll.u32 %s1209_s27, 5 }
  0x26   : > { %v429_v2 = vld [vmem:[%s400_s16] sm:$0xf]  ;;  %v438_v3 = vsel %vm433_vm0, %v430_v1, 0  ;;  %v492_v4 = vunpack.c.l.b16 %v430_v1  ;;  %s1123_s0 = scalar_lea.hbm %s1452_s7, 64 }
  0x27   : > { %v487_v5 = vunpack.c.l.b16 %v429_v2  ;;  %447 = vmatpush.bf16.xpose.msra.mxu0 %v438_v3 }
  0x28   : > { %v493_v6 = vpack.c.b16 %v492_v4, %v492_v4  ;;  %v462_v44 = vld [vmem:[#allocation2] sm:$0xff] }
  0x29   : > { %v488_v7 = vpack.c.b16 %v487_v5, %v487_v5  ;;  %s414_s12 = scalar_lea.vmem %s1461_s2, %s941_s23  ;;  %s1358_s23 = sand.u32 1, %s1201_s25  }
  0x2a   : > { %494 = vrot.lane.b32.xlu0 %v493_v6, %s1223_s18  ;;  %v431_v9 = vld [vmem:[%s414_s12] sm:$0xf]  ;;  %s940_s15 = sshll.u32 %s1358_s23, 5  ;;  %s730_s12 = scalar_lea.sflag [#allocation8], %s1358_s23 }
  0x2b   : > { %489 = vrot.lane.b32.xlu1 %v488_v7, %s1223_s18  ;;  %557 = vrot.lane.b32.xlu2 %v488_v7, %s1224_s19  ;;  %v469_v10 = vsel %vm467_vm1, %v431_v9, 0  ;;  %v527_v11 = vunpack.c.l.b16 %v431_v9  ;;  %s1364_s16 = scalar_lea.vmem [#allocation7], %s940_s15  ;;  %v973_v9 = vld [vmem:[#allocation3 + $0x8] sm:$0xff] }
  0x2c   : > { %478 = vmatpush.bf16.msra.mxu1 %v469_v10  ;;  %v972_v10 = vld [vmem:[#allocation3] sm:$0xff]  ;;  %s759_s22 = sshll.u32 %s1364_s16, 4  ;;  %s760_s22 = int_to_ptr.vmem [resolvable:$true] %s759_s22 }
  0x2d   : > { %v528_v12 = vpack.c.b16 %v527_v11, %v527_v11 }
  0x2e   : > { %945 = vmatmul.msk.bf16.vlgmr.msra.gmra.mxu0 %vm433_vm0, %v429_v2 }
  0x32   : > { %455 = vperm.xlu0 %1060, %v432_v8  }
  0x33   : > { %559 = vrot.lane.b32.xlu1 %v493_v6, %s1224_s19  ;;  %621 = vrot.lane.b32.xlu2 %v493_v6, %s1225_s8 }
  0x3a   : > { %529 = vrot.lane.b32.xlu0 %v528_v12, %s1223_s18  ;;  %s1231_s18 = smov 24  }
  0x3b   : > { %619 = vrot.lane.b32.xlu1 %v488_v7, %s1225_s8  ;;  %516 = vperm.xlu2 %1061, %v432_v8  }
  0x3c   : > { %1063 = vset.pattern.permute.xlu0 %v1228_v26 }
  0x42   : > { %643 = vperm.xlu0 %1063, %v432_v8  }
  0x43   : > { %581 = vperm.xlu1 %1062, %v432_v8   ;;  %591 = vrot.lane.b32.xlu2 %v528_v12, %s1224_s19  ;;  %s1232_s19 = smov 16  }
  0x4b   : > { %653 = vrot.lane.b32.xlu1 %v528_v12, %s1225_s8  ;;  %s758_s8 = scalar_lea.hbm %s1452_s7, %s974_s20 }
  0x4c   : > { %s761_s10 = sshll.u32 %s758_s8, 4  ;;  %s762_s10 = int_to_ptr.hbm [resolvable:$true] %s761_s10 }
  0x4d   : > { %s1117_s15 = sshra.s32 %s762_s10, 4  ;;  %s1118_s15 = int_to_ptr.hbm [resolvable:$true] %s1117_s15 }
  0x4e   : > { %p1124_p5 = scmp.lt.s32.totalorder %s1118_s15, %s1452_s7 }
  0x85   : > { %v558_v16 = vpop.permute.xlu2 %557 }
  0x8d   : > { %v622_v20 = vpop.permute.xlu2 %621 }
  0x8e   : > { %v627_v23 = vsel %vm433_vm0, %v622_v20, 0 }
  0x8f   : > { %636 = vmatpush.bf16.xpose.msrb.mxu0 %v627_v23 }
  0x95   : > { %v517_v35 = vpop.permute.xlu2 %516 }
  0x9c   : > { %v495_v13 = vpop.permute.xlu0 %494 }
  0x9d   : > { %v490_v14 = vpop.permute.xlu1 %489  ;;  %v500_v15 = vsel %vm433_vm0, %v495_v13, 0  ;;  %v592_v36 = vpop.permute.xlu2 %591 }
  0x9e   : > { %509 = vmatpush.bf16.xpose.msra.mxu2 %v500_v15  ;;  %v597_v37 = vsel %vm467_vm1, %v592_v36, 0 }
  0xa4   : > { %v456_v19 = vpop.permute.xlu0 %455 }
  0xa5   : > { %v560_v17 = vpop.permute.xlu1 %559  ;;  %947 = vmatmul.msk.bf16.vlgmr.msra.gmra.mxu2 %vm433_vm0, %v490_v14 }
  0xa6   : > { %v565_v18 = vsel %vm433_vm0, %v560_v17, 0 }
  0xa7   : > { %574 = vmatpush.bf16.xpose.msrb.mxu1 %v565_v18 }
  0xab   : > { %v449_v24 = vpop.f32.mrf.mxu0 }
  0xac   : > { %v458_v25 = vsub.f32 %v449_v24, %v456_v19  ;;  %v530_v32 = vpop.permute.xlu0 %529 }
  0xad   : > { %v620_v28 = vpop.permute.xlu1 %619  ;;  %v535_v34 = vsel %vm467_vm1, %v530_v32, 0 }
  0xae   : > { %v459_v27 = vmul.f32 1.442695, %v458_v25  ;;  %953 = vmatmul.msk.bf16.vlgmr.msrb.gmra.mxu0 %vm433_vm0, %v620_v28  ;;  %544 = vmatpush.bf16.msra.mxu3 %v535_v34 }
  0xb0   : > { %1065 = vpow2.f32 %v459_v27 }
  0xb2   : > { %606 = vmatpush.bf16.msrb.mxu3 %v597_v37 }
  0xb3   : > { %v451_v29 = vpop.f32.mrf.mxu0 }
  0xb4   : > { %v644_v46 = vpop.permute.xlu0 %643 }
  0xb5   : > { %v582_v41 = vpop.permute.xlu1 %581 }
  0xb6   : > { %v1066_v30 = vpop.eup %1065 }
  0xb7   : > { %v463_v31 = vpack.c.bf16 %v1066_v30, %v1066_v30  ;;  %461 = vst.msk [vmem:[%s1364_s16] sm:$0xff] %vm433_vm0, %v1066_v30 }
  0xb9   : > { %946 = vmatmul.msk.bf16.vlgmr.msra.gmra.mxu1 %vm433_vm0, %v463_v31 }
  0xba   : > { %716 = vmatpush.bf16.msra.mxu1 %v973_v9 }
  0xbd   : > { %v654_v49 = vpop.permute.xlu1 %653 }
  0xbe   : > { %v659_v51 = vsel %vm467_vm1, %v654_v49, 0  ;;  %717 = vmatpush.bf16.msra.mxu1 %v972_v10 }
  0xbf   : > { %668 = vmatpush.bf16.msrb.mxu2 %v659_v51 }
  0xc9   : > { %950 = vmatmul.msk.bf16.vlgmr.msrb.gmra.mxu1 %vm433_vm0, %v558_v16 }
 0x128   : > { %v511_v38 = vpop.f32.mrf.mxu2 }
 0x129   : > { %v519_v39 = vsub.f32 %v511_v38, %v517_v35 }
 0x12b   : > { %v520_v40 = vmul.f32 1.442695, %v519_v39  ;;  %v638_v47 = vpop.f32.mrf.mxu0 }
 0x12c   : > { %v646_v48 = vsub.f32 %v638_v47, %v644_v46 }
 0x12d   : > { %1067 = vpow2.f32 %v520_v40 }
 0x12e   : > { %v647_v53 = vmul.f32 1.442695, %v646_v48 }
 0x130   : > { %v513_v42 = vpop.f32.mrf.mxu2  ;;  %1069 = vpow2.f32 %v647_v53 }
 0x133   : > { %v1068_v43 = vpop.eup %1067  ;;  %v640_v54 = vpop.f32.mrf.mxu0 }
 0x134   : > { %v525_v45 = vpack.c.bf16 %v1068_v43, %v1068_v43  ;;  %948 = vst.msk [vmem:[%s1364_s16 + $0x8] sm:$0xff] %vm433_vm0, %v1068_v43 }
 0x136   : > { %v480_v50 = vpop.f32.mrf.mxu1  ;;  %949 = vmatmul.msk.bf16.vlgmr.msra.gmra.mxu3 %vm433_vm0, %v525_v45  ;;  %v1070_v56 = vpop.eup %1069 }
 0x137   : > { %v484_v52 = vadd.f32 %v480_v50, %v462_v44  ;;  %v652_v57 = vpack.c.bf16 %v1070_v56, %v1070_v56  ;;  %954 = vst.msk [vmem:[%s1364_s16 + $0x18] sm:$0xff] %vm433_vm0, %v1070_v56 }
 0x139   : > { %485 = vst.msk [vmem:[#allocation2] sm:$0xff] %vm433_vm0, %v484_v52  ;;  %955 = vmatmul.msk.bf16.vlgmr.msrb.gmra.mxu2 %vm433_vm0, %v652_v57 }
 0x13e   : > { %v482_v55 = vpop.f32.mrf.mxu1 }
 0x140   : > { %v524_v7 = vld [vmem:[#allocation2] sm:$0xff] }
 0x146   : > { %v576_v58 = vpop.f32.mrf.mxu1 }
 0x147   : > { %v584_v59 = vsub.f32 %v576_v58, %v582_v41 }
 0x149   : > { %v585_v60 = vmul.f32 1.442695, %v584_v59 }
 0x14b   : > { %1071 = vpow2.f32 %v585_v60 }
 0x14e   : > { %v578_v61 = vpop.f32.mrf.mxu1 }
 0x151   : > { %v1072_v62 = vpop.eup %1071 }
 0x152   : > { %v590_v63 = vpack.c.bf16 %v1072_v62, %v1072_v62  ;;  %951 = vst.msk [vmem:[%s1364_s16 + $0x10] sm:$0xff] %vm433_vm0, %v1072_v62 }
 0x154   : > { %952 = vmatmul.msk.bf16.vlgmr.msrb.gmra.mxu3 %vm433_vm0, %v590_v63 }
 0x1b9   : > { %v546_v0 = vpop.f32.mrf.mxu3 }
 0x1ba   : > { %551 = vrot.lane.b32.xlu2 %v546_v0, %s1453_s17 }
 0x1bc   : > { %v670_v2 = vpop.f32.mrf.mxu2 }
 0x1c1   : > { %v548_v1 = vpop.f32.mrf.mxu3 }
 0x1c2   : > { %675 = vrot.lane.b32.xlu2 %v670_v2, %s1231_s18  ;;  %s1119_s18 = scalar_lea.hbm %s1118_s15, 32 }
 0x1c3   : > { %p1120_p1 = scmp.ne.s32.totalorder %s1118_s15, %s1119_s18  ;;  %p1125_p6 = scmp.lt.s32.totalorder %s1123_s0, %s1119_s18 }
 0x1c4   : > { %v672_v3 = vpop.f32.mrf.mxu2 }
 0x1c5   : > { %p1121_p2 = pnand %p1120_p1, %p1314_p4  ;;  %p1126_p7 = por %p1125_p6, %p1124_p5 }
 0x1c7   : > { %p1122_p3 = pneg %p1121_p2 }
 0x1c9   : > { %p1127_p9 = pnand %p1126_p7, %p1122_p3 }
 0x1d7   : > { %v608_v4 = vpop.f32.mrf.mxu3 }
 0x1d8   : > { %613 = vrot.lane.b32.xlu1 %v608_v4, %s1232_s19 }
 0x1df   : > { %v610_v5 = vpop.f32.mrf.mxu3 }
 0x214   : > { %v552_v6 = vpop.permute.xlu2 %551 }
 0x215   : > { %v554_v8 = vadd.f32 %v552_v6, %v524_v7 }
 0x217   : > { %556 = vst.msk [vmem:[#allocation2] sm:$0xff] %vm555_vm3, %v554_v8 }
 0x21c   : > { %v676_v14 = vpop.permute.xlu2 %675 }
 0x21e   : > { %v589_v12 = vld [vmem:[#allocation2] sm:$0xff] }
 0x24a   : > { %v614_v11 = vpop.permute.xlu1 %613 }
 0x24b   : > { %v616_v13 = vadd.f32 %v614_v11, %v589_v12 }
 0x24d   : > { %618 = vst.msk [vmem:[#allocation2] sm:$0xff] %vm617_vm4, %v616_v13 }
 0x254   : > { %v651_v15 = vld [vmem:[#allocation2] sm:$0xff] }
 0x255   : > { %v678_v16 = vadd.f32 %v676_v14, %v651_v15 }
 0x257   : > { %680 = vst.msk [vmem:[#allocation2] sm:$0xff] %vm679_vm5, %v678_v16 }
 0x25e   : > { %v684_v17 = vld [vmem:[#allocation2] sm:$0xff] }
 0x25f   : > { %v685_v18 = vpack.c.bf16 %v684_v17, %v684_v17 }
 0x261   : > { %964 = vmatmul.msk.bf16.vlgmr.msra.gmra.mxu1 %vm427_vm2, %v685_v18 }
 0x262   : > { %1130 = shalt.err (!%p1127_p9)
}
 0x263   : > { %s1233_s16 = smov 128   ;;  %s1462_s20 = smov 8   ;;  %v1064_v19 = vld [vmem:[%s1450_s5] ss:$0 sm:$0xff] }
 0x264   : > { %980 = dma.vmem_to_hbm [thread:$0]  (%p1314_p4), %s760_s22, 512, %s762_s10, %s730_s12, %s1233_s16, %s1233_s16, %s1462_s20  }
 0x265   : > { %s967_s21 = sshll.u32 %s1209_s27, 3  ;;  %s939_s30 = sshll.u32 %s1358_s23, 3 }
 0x266   : > { %s741_s1 = scalar_lea.hbm %s1451_s6, %s967_s21  ;;  %s386_s15 = scalar_lea.vmem [#allocation6], %s939_s30 }
 0x267   : > { %s743_s18 = sshll.u32 %s386_s15, 4  ;;  %s745_s19 = sshll.u32 %s741_s1, 4  ;;  %s744_s18 = int_to_ptr.vmem [resolvable:$true] %s743_s18  ;;  %s746_s19 = int_to_ptr.hbm [resolvable:$true] %s745_s19 }
 0x268   : > { %s725_s27 = scalar_lea.sflag [#allocation5], %s1358_s23  ;;  %s1145_s22 = sshra.s32 %s746_s19, 4  ;;  %s1146_s22 = int_to_ptr.hbm [resolvable:$true] %s1145_s22 }
 0x269   : > { %s1147_s10 = scalar_lea.hbm %s1146_s22, 8  ;;  %s1151_s20 = scalar_lea.hbm %s1451_s6, 16 }
 0x26a   : > { %p1148_p10 = scmp.ne.s32.totalorder %s1146_s22, %s1147_s10  ;;  %p1152_p13 = scmp.lt.s32.totalorder %s1146_s22, %s1451_s6 }
 0x26b   : > { %p1153_p0 = scmp.lt.s32.totalorder %s1151_s20, %s1147_s10 }
 0x26c   : > { %p1149_p11 = pnand %p1148_p10, %p1314_p4 }
 0x26d   : > { %p1154_p1 = por %p1153_p0, %p1152_p13 }
 0x26e   : > { %p1150_p12 = pneg %p1149_p11 }
 0x270   : > { %p1155_p2 = pnand %p1154_p1, %p1150_p12 }
 0x2de   : > { %v719_v20 = vpop.f32.mrf.mxu1 }
 0x2df   : > { %v720_v21 = vadd.f32 %v1064_v19, %v719_v20 }
 0x2e1   : > { %723 = vst.msk [vmem:[%s386_s15] sm:$0xff] %vm427_vm2, %v720_v21 }
 0x2e2   : > { %1158 = shalt.err (!%p1155_p2)
}
 0x2e3   : > { %979 = dma.vmem_to_hbm [thread:$0]  (%p1314_p4), %s744_s18, 128, %s746_s19, %s725_s27  }
 0x2e6   : > { %v721_v22 = vpop.f32.mrf.mxu1 }
 0x2e7 PF: > { %p996_p3 = scmp.ge.s32.totalorder %s1217_s29, 2  ;;  %s776_s23 = sand.u32 1, %s1197_s24  }
 0x2e8   : > { %s777_s17 = scalar_lea.sflag [#allocation5], %s776_s23 }
 0x2e9   : > { %p988_p5 = pnand %p996_p3, %p1321_p8 }
 0x2eb   : > { %p989_p6 = pneg %p988_p5 }
 0x2ed   : > { %1188 = dma.done.wait (%p989_p6), %s777_s17, 128  }
 0x2ee   : > { %1190 = vsyncadd (%p989_p6), %s777_s17, 4294967168  ;;  %s787_s8 = scalar_lea.sflag [#allocation8], %s776_s23 }
 0x2ef   : > { %1192 = dma.done.wait (%p989_p6), %s787_s8, 512  }
 0x2f0   : > { %1194 = vsyncadd (%p989_p6), %s787_s8, 4294966784  ;;  %s25_s29 = sadd.s32 1, %s1217_s29   ;;  %s1463_s24 = smov %s1201_s25 }
 0x2f1   : > { %p22_p7 = scmp.ge.s32.totalorder %s25_s29, 4   ;;  %s1464_s25 = smov %s1205_s26 }
 0x2f2   : > { %s1465_s26 = smov %s1327_s14  ;;  %s1466_s27 = smov %s1213_s28 }
 0x2f3   : > { %s1467_s28 = smov %s1469_s9  ;;  %24 = sbr.rel (!%p22_p7) target bundleno = 11 (0xb), region = 121 }
 0x2f8   :  { %793 = vsyncpa [#allocation4], 1 }
 0x2f9   :  { %795 = vsyncpa [#allocation4 + $0x1], 1 }
 0x2fa   :  { %796 = vsyncpa [#allocation5], 1 }
 0x2fb   :  { %798 = vsyncpa [#allocation5 + $0x1], 1 }
 0x2fc   :  { %799 = vsyncpa [#allocation8], 1 }
 0x2fd   :  { %801 = vsyncpa [#allocation8 + $0x1], 1 }

</bundles_post_ra>
